<compile_context>
chip_gen: v5e
topology: v5e:2x2
jax: 0.10.0
libtpu: 0.0.40
codegen_flags: <defaults>
</compile_context>

<pallas_src>
import jax
import jax.numpy as jnp
from jax.experimental import pallas as pl
from jax.experimental.pallas import tpu as pltpu

IN_CH = 4
OUT_CH = 32
BOT_CH = 32
KERNEL_SIZES = (10, 20, 40)
MAX_K = max(KERNEL_SIZES)
PAD_L = (MAX_K - 1) // 2          # 19 (PyTorch 'same' left pad for K=40)
PAD_R = (MAX_K - 1) - PAD_L       # 20
BN_EPS = 1e-5

CHUNK_TAPS = 8                    # taps per MXU chunk -> contraction depth 256
N_CHUNKS = MAX_K // CHUNK_TAPS    # 5
assert MAX_K % CHUNK_TAPS == 0


# ----------------------------------------------------------------------------
# Kernel 1: bottleneck + chunked merged branch convs + maxpool branch,
#           plus fused per-channel batch-norm partial sums.
# ----------------------------------------------------------------------------
def conv_stats_kernel(x_ref, wb_ref, wm_ref, wmp_ref, z_ref, stats_ref):
    NB = z_ref.shape[0]           # samples per grid step (static)
    L = z_ref.shape[2]

    wb = wb_ref[...]              # (BOT_CH, IN_CH)            bf16
    wm = wm_ref[...]              # (3*OUT_CH, MAX_K*BOT_CH)    bf16
    wmp = wmp_ref[...]            # (OUT_CH, IN_CH)             bf16

    s1 = jnp.zeros((4 * OUT_CH, 1), jnp.float32)
    s2 = jnp.zeros((4 * OUT_CH, 1), jnp.float32)

    for s in range(NB):           # static unroll over the per-step batch
        xp = x_ref[s]                               # (IN_CH, L+MAX_K-1)  f32
        xp_bf = xp.astype(jnp.bfloat16)

        # Bottleneck 1x1 conv on the replicate-padded input == replicate-
        # padded bottleneck output (pointwise op), so the wide convs can
        # slice it directly.  (Bias dropped — cancelled by BN.)
        xbp = jnp.dot(wb, xp_bf, preferred_element_type=jnp.float32)
        xbp = xbp.astype(jnp.bfloat16)              # (BOT_CH, L+MAX_K-1)

        # All three branch convs as one im2col contraction, evaluated in
        # tap chunks of 8 (depth 256) so the lag slab stays in registers.
        acc = None
        for c in range(N_CHUNKS):
            t0 = c * CHUNK_TAPS
            x_chunk = jnp.concatenate(
                [xbp[:, t0 + j:t0 + j + L] for j in range(CHUNK_TAPS)],
                axis=0)                             # (CHUNK_TAPS*BOT_CH, L)
            part = jnp.dot(
                wm[:, t0 * BOT_CH:(t0 + CHUNK_TAPS) * BOT_CH], x_chunk,
                preferred_element_type=jnp.float32)  # (3*OUT_CH, L) f32
            acc = part if acc is None else acc + part

        # MaxPool1d(kernel=3, stride=1, padding=1): implicit -inf padding,
        # which at the edges equals replicate padding -> reuse xp slices.
        # Max done in f32 (v5e has no bf16 VALU); cast to bf16 for the MXU.
        x_c = xp[:, PAD_L:PAD_L + L]
        mp = jnp.maximum(jnp.maximum(xp[:, PAD_L - 1:PAD_L - 1 + L], x_c),
                         xp[:, PAD_L + 1:PAD_L + 1 + L])
        z3 = jnp.dot(wmp, mp.astype(jnp.bfloat16),
                     preferred_element_type=jnp.float32)     # (OUT_CH, L)

        # Concatenate at the vreg-aligned sublane boundary (96 % 8 == 0) and
        # store the sample's full channel block in one lane-dense write.
        z_s = jnp.concatenate([acc, z3], axis=0)             # (4*OUT_CH, L)
        z_ref[s] = z_s

        # Fused BN partial statistics (per channel, over this block's N and L).
        s1 = s1 + jnp.sum(z_s, axis=1, keepdims=True)
        s2 = s2 + jnp.sum(z_s * z_s, axis=1, keepdims=True)

    # Per-block partials: rows [0,128) = sum z, rows [128,256) = sum z^2.
    stats_ref[...] = jnp.concatenate([s1, s2], axis=0)       # (2*4*OUT_CH, 1)


# ----------------------------------------------------------------------------
# Kernel 2: streaming BatchNorm (pre-folded per-channel affine) + ReLU.
# TODO(synk): running_mean / running_var buffer updates (training side effect)
#             are not modeled.
# ----------------------------------------------------------------------------
def bn_relu_apply_kernel(z_ref, a_ref, b_ref, out_ref):
    a = a_ref[...][None]          # (1, 4*OUT_CH, 1)
    b = b_ref[...][None]
    out_ref[...] = jnp.maximum(z_ref[...] * a + b, 0.0)


# ----------------------------------------------------------------------------
# Host-side helpers.
# ----------------------------------------------------------------------------
def _build_merged_branch_weight(params):
    """Zero-padded merged weight (3*O, MAX_K*BOT_CH) in (tap, channel) order."""
    wm = jnp.zeros((3 * OUT_CH, MAX_K, BOT_CH), jnp.float32)
    for bi, (k, name) in enumerate(zip(KERNEL_SIZES, ('w0', 'w1', 'w2'))):
        off = PAD_L - (k - 1) // 2        # tap offset inside the 40-tap window
        w_okc = jnp.transpose(params[name], (0, 2, 1))        # (O, K, C)
        wm = wm.at[bi * OUT_CH:(bi + 1) * OUT_CH, off:off + k, :].set(w_okc)
    return wm.reshape(3 * OUT_CH, MAX_K * BOT_CH)


def _pick_batch_block(n, max_b):
    """Largest divisor of n that is <= max_b, preferring >= 2 grid steps
    so the v7x two-TensorCore 'parallel' split stays useful."""
    max_b = max(1, min(max_b, n))
    cands = [b for b in range(1, max_b + 1) if n % b == 0]
    pref = [b for b in cands if n // b >= 2]
    return max(pref) if pref else max(cands)


def _vmem_limit(*byte_counts):
    """Explicit VMEM budget: double-buffered blocks + headroom, clamped to a
    range that is safe on v5e/v6e (128 MiB) and v7x (64 MiB physical)."""
    est = 2 * sum(int(b) for b in byte_counts) + (8 << 20)
    return int(min(max(est, 32 << 20), 48 << 20))


@jax.jit
def inception_forward(x, params):
    N, _, L = x.shape
    Lp = L + MAX_K - 1
    C4 = 4 * OUT_CH

    # Replicate ('edge') pad once to the widest kernel's 'same' padding.
    # Kept in f32; the kernel casts to bf16 right before each MXU matmul.
    xpad = jnp.pad(x.astype(jnp.float32), ((0, 0), (0, 0), (PAD_L, PAD_R)),
                   mode='edge')

    wb = params['wb'].astype(jnp.bfloat16)
    wm = _build_merged_branch_weight(params).astype(jnp.bfloat16)
    wmp = params['wmp'].astype(jnp.bfloat16)
    # NOTE: conv biases (bb, b0/b1/b2, bmp) are intentionally NOT passed —
    # training-mode BN mean subtraction cancels them exactly.

    # --- Stage 1: conv branches + fused BN partial statistics ---------------
    nb_cap = max(1, (8 << 20) // (C4 * L * 4))        # keep z block modest
    NB = _pick_batch_block(N, min(8, nb_cap))
    n_blocks = N // NB

    def w_spec(arr):                  # whole (2-D) weight, same every step
        return pl.BlockSpec(arr.shape, lambda n: (0, 0))

    conv_vmem = _vmem_limit(NB * IN_CH * Lp * 4,      # input block
                            NB * C4 * L * 4,          # z output block
                            2 * C4 * 4,               # stats block
                            (wb.size + wm.size + wmp.size) * 2)

    z, stats = pl.pallas_call(
        conv_stats_kernel,
        out_shape=(jax.ShapeDtypeStruct((N, C4, L), jnp.float32),
                   jax.ShapeDtypeStruct((n_blocks, 2 * C4, 1), jnp.float32)),
        grid=(n_blocks,),
        in_specs=[
            pl.BlockSpec((NB, IN_CH, Lp), lambda n: (n, 0, 0)),
            w_spec(wb), w_spec(wm), w_spec(wmp),
        ],
        out_specs=(
            pl.BlockSpec((NB, C4, L), lambda n: (n, 0, 0)),
            pl.BlockSpec((None, 2 * C4, 1), lambda n: (n, 0, 0)),
        ),
        compiler_params=pltpu.CompilerParams(
            dimension_semantics=("parallel",),        # megacore batch split
            vmem_limit_bytes=conv_vmem),
    )(xpad, wb, wm, wmp)

    # --- Reduce partial stats and fold BN into one per-channel affine -------
    stats_sum = jnp.sum(stats, axis=0)                # (2*C4, 1)
    s1, s2 = stats_sum[:C4], stats_sum[C4:]
    cnt = jnp.float32(N * L)
    mean = s1 / cnt
    var = s2 / cnt - mean * mean                      # biased (training) var
    a = params['gamma'].reshape(-1, 1).astype(jnp.float32) \
        * jax.lax.rsqrt(var + BN_EPS)
    b = params['beta'].reshape(-1, 1).astype(jnp.float32) - mean * a

    # --- Stage 2: streaming affine + ReLU ------------------------------------
    nb2_cap = max(1, (4 << 20) // (C4 * L * 4))
    NB2 = _pick_batch_block(N, min(32, nb2_cap))
    bn_vmem = _vmem_limit(NB2 * C4 * L * 4,           # z input block
                          NB2 * C4 * L * 4,           # output block
                          2 * C4 * 4)

    out = pl.pallas_call(
        bn_relu_apply_kernel,
        out_shape=jax.ShapeDtypeStruct((N, C4, L), jnp.float32),
        grid=(N // NB2,),
        in_specs=[
            pl.BlockSpec((NB2, C4, L), lambda n: (n, 0, 0)),
            pl.BlockSpec((C4, 1), lambda n: (0, 0)),
            pl.BlockSpec((C4, 1), lambda n: (0, 0)),
        ],
        out_specs=pl.BlockSpec((NB2, C4, L), lambda n: (n, 0, 0)),
        compiler_params=pltpu.CompilerParams(
            dimension_semantics=("parallel",),
            vmem_limit_bytes=bn_vmem),
    )(z, a, b)
    return out


# ----------------------------------------------------------------------------
# Pure-JAX f32 reference mirroring the PyTorch module (training-mode BN,
# replicate padding, conv biases included).
# ----------------------------------------------------------------------------
def reference_forward(x, params):
    def conv_same_ref(xin, w, b, K):
        pad_l = (K - 1) // 2
        pad_r = K - 1 - pad_l
        xp = jnp.pad(xin, ((0, 0), (0, 0), (pad_l, pad_r)), mode='edge')
        y = jax.lax.conv_general_dilated(
            xp, w, window_strides=(1,), padding='VALID',
            dimension_numbers=('NCH', 'OIH', 'NCH'))
        return y + b[None, :, None]

    xb = jnp.einsum('oc,ncl->nol', params['wb'], x) + params['bb'][None, :, None]
    z0 = conv_same_ref(xb, params['w0'], params['b0'], 10)
    z1 = conv_same_ref(xb, params['w1'], params['b1'], 20)
    z2 = conv_same_ref(xb, params['w2'], params['b2'], 40)
    xmp = jnp.pad(x, ((0, 0), (0, 0), (1, 1)), constant_values=-jnp.inf)
    mp = jnp.maximum(jnp.maximum(xmp[:, :, 0:-2], xmp[:, :, 1:-1]), xmp[:, :, 2:])
    z3 = jnp.einsum('oc,ncl->nol', params['wmp'], mp) + params['bmp'][None, :, None]
    z = jnp.concatenate([z0, z1, z2, z3], axis=1)
    mean = jnp.mean(z, axis=(0, 2), keepdims=True)
    var = jnp.var(z, axis=(0, 2), keepdims=True)
    y = (z - mean) / jnp.sqrt(var + BN_EPS)
    y = y * params['gamma'][None, :, None] + params['beta'][None, :, None]
    return jnp.maximum(y, 0.0)


if __name__ == "__main__":
    key = jax.random.PRNGKey(0)
    ks = jax.random.split(key, 13)

    params = {
        'wb':  jax.random.normal(ks[1], (BOT_CH, IN_CH), jnp.float32) * 0.3,
        'bb':  jax.random.normal(ks[2], (BOT_CH,), jnp.float32) * 0.1,
        'w0':  jax.random.normal(ks[3], (OUT_CH, BOT_CH, 10), jnp.float32) * 0.10,
        'b0':  jax.random.normal(ks[4], (OUT_CH,), jnp.float32) * 0.1,
        'w1':  jax.random.normal(ks[5], (OUT_CH, BOT_CH, 20), jnp.float32) * 0.07,
        'b1':  jax.random.normal(ks[6], (OUT_CH,), jnp.float32) * 0.1,
        'w2':  jax.random.normal(ks[7], (OUT_CH, BOT_CH, 40), jnp.float32) * 0.05,
        'b2':  jax.random.normal(ks[8], (OUT_CH,), jnp.float32) * 0.1,
        'wmp': jax.random.normal(ks[9], (OUT_CH, IN_CH), jnp.float32) * 0.3,
        'bmp': jax.random.normal(ks[10], (OUT_CH,), jnp.float32) * 0.1,
        'gamma': jnp.ones((4 * OUT_CH,), jnp.float32),   # PyTorch BN default init
        'beta':  jnp.zeros((4 * OUT_CH,), jnp.float32),
    }

    # Two configs: NB=1 path (N=2) and NB>1 path (N=4) with a longer L.
    for cfg_key, (N, L) in zip((ks[0], ks[11]), ((2, 128), (4, 256))):
        x = jax.random.normal(cfg_key, (N, IN_CH, L), jnp.float32)

        out = inception_forward(x, params)
        jax.block_until_ready(out)
        assert out.shape == (N, 4 * OUT_CH, L) and out.dtype == jnp.float32

        # Tolerance accommodates bf16 MXU inputs vs the f32 reference;
        # real structural bugs produce O(0.1-1) errors.
        ref = reference_forward(x, params)
        assert jnp.allclose(out, ref, rtol=2e-2, atol=2e-2), \
            f"mismatch vs pure-JAX reference at N={N}, L={L}"

    print("KERNEL_OK")
</pallas_src>

<mosaic_0001>
module attributes {stable_mosaic.version = 11 : i64} {
  func.func @bn_relu_apply_kernel(%arg0: i32, %arg1: memref<1x128x128xf32, #tpu.memory_space<vmem>>, %arg2: memref<128x1xf32, #tpu.memory_space<vmem>>, %arg3: memref<128x1xf32, #tpu.memory_space<vmem>>, %arg4: memref<1x128x128xf32, #tpu.memory_space<vmem>>) attributes {dimension_semantics = [#tpu.dimension_semantics<parallel>], iteration_bounds = array<i64: 2>, scalar_prefetch = 0 : i64, scratch_operands = 0 : i64, tpu.core_type = #tpu.core_type<tc>, window_params = [{transform_indices = @transform_0, window_bounds = array<i64: 1, 128, 128>}, {pipeline_mode = #tpu.pipeline_mode<synchronous>, transform_indices = @transform_1, window_bounds = array<i64: 128, 1>}, {pipeline_mode = #tpu.pipeline_mode<synchronous>, transform_indices = @transform_2, window_bounds = array<i64: 128, 1>}, {transform_indices = @transform_3, window_bounds = array<i64: 1, 128, 128>}]} {
    %c0 = arith.constant 0 : index
    %c0_0 = arith.constant 0 : index
    %0 = vector.load %arg2[%c0, %c0_0] : memref<128x1xf32, #tpu.memory_space<vmem>>, vector<128x1xf32>
    %1 = vector.shape_cast %0 : vector<128x1xf32> to vector<1x128x1xf32>
    %c0_1 = arith.constant 0 : index
    %c0_2 = arith.constant 0 : index
    %2 = vector.load %arg3[%c0_1, %c0_2] : memref<128x1xf32, #tpu.memory_space<vmem>>, vector<128x1xf32>
    %3 = vector.shape_cast %2 : vector<128x1xf32> to vector<1x128x1xf32>
    %c0_3 = arith.constant 0 : index
    %c0_4 = arith.constant 0 : index
    %c0_5 = arith.constant 0 : index
    %4 = vector.load %arg1[%c0_3, %c0_4, %c0_5] : memref<1x128x128xf32, #tpu.memory_space<vmem>>, vector<1x128x128xf32>
    %5 = vector.broadcast %1 : vector<1x128x1xf32> to vector<1x128x128xf32>
    %6 = arith.mulf %4, %5 : vector<1x128x128xf32>
    %7 = vector.broadcast %3 : vector<1x128x1xf32> to vector<1x128x128xf32>
    %8 = arith.addf %6, %7 : vector<1x128x128xf32>
    %cst = arith.constant 0.000000e+00 : f32
    %9 = vector.broadcast %cst : f32 to vector<1x128x128xf32>
    %10 = arith.maximumf %8, %9 : vector<1x128x128xf32>
    %c0_6 = arith.constant 0 : index
    %c0_7 = arith.constant 0 : index
    %c0_8 = arith.constant 0 : index
    %11 = vector.load %arg4[%c0_6, %c0_7, %c0_8] : memref<1x128x128xf32, #tpu.memory_space<vmem>>, vector<1x128x128xf32>
    tpu.vector_store %arg4[%c0_6, %c0_7, %c0_8], %10 {strides = array<i32>} : memref<1x128x128xf32, #tpu.memory_space<vmem>>, vector<1x128x128xf32>,
    return
  }
  func.func @transform_0(%arg0: i32) -> (i32, i32, i32) {
    %c0_i32 = arith.constant 0 : i32
    %c0_i32_0 = arith.constant 0 : i32
    %c0_i32_1 = arith.constant 0 : i32
    return %arg0, %c0_i32, %c0_i32_0 : i32, i32, i32
  }
  func.func @transform_1(%arg0: i32) -> (i32, i32) {
    %c0_i32 = arith.constant 0 : i32
    %c0_i32_0 = arith.constant 0 : i32
    %c0_i32_1 = arith.constant 0 : i32
    return %c0_i32, %c0_i32_0 : i32, i32
  }
  func.func @transform_2(%arg0: i32) -> (i32, i32) {
    %c0_i32 = arith.constant 0 : i32
    %c0_i32_0 = arith.constant 0 : i32
    %c0_i32_1 = arith.constant 0 : i32
    return %c0_i32, %c0_i32_0 : i32, i32
  }
  func.func @transform_3(%arg0: i32) -> (i32, i32, i32) {
    %c0_i32 = arith.constant 0 : i32
    %c0_i32_0 = arith.constant 0 : i32
    %c0_i32_1 = arith.constant 0 : i32
    return %arg0, %c0_i32, %c0_i32_0 : i32, i32, i32
  }
}

module attributes {stable_mosaic.version = 11 : i64} {
  func.func @conv_stats_kernel(%arg0: i32, %arg1: memref<1x4x167xf32, #tpu.memory_space<vmem>>, %arg2: memref<32x4xbf16, #tpu.memory_space<vmem>>, %arg3: memref<96x1280xbf16, #tpu.memory_space<vmem>>, %arg4: memref<32x4xbf16, #tpu.memory_space<vmem>>, %arg5: memref<1x128x128xf32, #tpu.memory_space<vmem>>, %arg6: memref<1x256x1xf32, #tpu.memory_space<vmem>>) attributes {dimension_semantics = [#tpu.dimension_semantics<parallel>], iteration_bounds = array<i64: 2>, scalar_prefetch = 0 : i64, scratch_operands = 0 : i64, tpu.core_type = #tpu.core_type<tc>, window_params = [{transform_indices = @transform_0, window_bounds = array<i64: 1, 4, 167>}, {pipeline_mode = #tpu.pipeline_mode<synchronous>, transform_indices = @transform_1, window_bounds = array<i64: 32, 4>}, {pipeline_mode = #tpu.pipeline_mode<synchronous>, transform_indices = @transform_2, window_bounds = array<i64: 96, 1280>}, {pipeline_mode = #tpu.pipeline_mode<synchronous>, transform_indices = @transform_3, window_bounds = array<i64: 32, 4>}, {transform_indices = @transform_4, window_bounds = array<i64: 1, 128, 128>}, {transform_indices = @transform_5, window_bounds = array<i64: 1, 256, 1>}]} {
    %c0 = arith.constant 0 : index
    %c0_0 = arith.constant 0 : index
    %0 = vector.load %arg2[%c0, %c0_0] : memref<32x4xbf16, #tpu.memory_space<vmem>>, vector<32x4xbf16>
    %c0_1 = arith.constant 0 : index
    %c0_2 = arith.constant 0 : index
    %1 = vector.load %arg3[%c0_1, %c0_2] : memref<96x1280xbf16, #tpu.memory_space<vmem>>, vector<96x1280xbf16>
    %c0_3 = arith.constant 0 : index
    %c0_4 = arith.constant 0 : index
    %2 = vector.load %arg4[%c0_3, %c0_4] : memref<32x4xbf16, #tpu.memory_space<vmem>>, vector<32x4xbf16>
    %cst = arith.constant 0.000000e+00 : f32
    %3 = vector.broadcast %cst : f32 to vector<128x1xf32>
    %cst_5 = arith.constant 0.000000e+00 : f32
    %4 = vector.broadcast %cst_5 : f32 to vector<128x1xf32>
    %c0_6 = arith.constant 0 : index
    %c0_7 = arith.constant 0 : index
    %c0_8 = arith.constant 0 : index
    %5 = vector.load %arg1[%c0_6, %c0_7, %c0_8] : memref<1x4x167xf32, #tpu.memory_space<vmem>>, vector<1x4x167xf32>
    %6 = vector.shape_cast %5 : vector<1x4x167xf32> to vector<4x167xf32>
    %7 = arith.truncf %6 : vector<4x167xf32> to vector<4x167xbf16>
    %cst_9 = arith.constant dense<0.000000e+00> : vector<32x167xf32>
    %8 = tpu.matmul %0, %7, %cst_9 {dimension_numbers = #tpu.dot_dimension_numbers<[1], [0], [0], [1], [0, 0, 1, 1], [], []>} : vector<32x4xbf16>, vector<4x167xbf16>, vector<32x167xf32> -> vector<32x167xf32>
    %9 = arith.truncf %8 : vector<32x167xf32> to vector<32x167xbf16>
    %10 = vector.extract_strided_slice %9 {offsets = [0, 0], sizes = [32, 128], strides = [1, 1]} : vector<32x167xbf16> to vector<32x128xbf16>
    %11 = vector.extract_strided_slice %9 {offsets = [0, 1], sizes = [32, 128], strides = [1, 1]} : vector<32x167xbf16> to vector<32x128xbf16>
    %12 = vector.extract_strided_slice %9 {offsets = [0, 2], sizes = [32, 128], strides = [1, 1]} : vector<32x167xbf16> to vector<32x128xbf16>
    %13 = vector.extract_strided_slice %9 {offsets = [0, 3], sizes = [32, 128], strides = [1, 1]} : vector<32x167xbf16> to vector<32x128xbf16>
    %14 = vector.extract_strided_slice %9 {offsets = [0, 4], sizes = [32, 128], strides = [1, 1]} : vector<32x167xbf16> to vector<32x128xbf16>
    %15 = vector.extract_strided_slice %9 {offsets = [0, 5], sizes = [32, 128], strides = [1, 1]} : vector<32x167xbf16> to vector<32x128xbf16>
    %16 = vector.extract_strided_slice %9 {offsets = [0, 6], sizes = [32, 128], strides = [1, 1]} : vector<32x167xbf16> to vector<32x128xbf16>
    %17 = vector.extract_strided_slice %9 {offsets = [0, 7], sizes = [32, 128], strides = [1, 1]} : vector<32x167xbf16> to vector<32x128xbf16>
    %18 = tpu.concatenate %10, %11, %12, %13, %14, %15, %16, %17 in 0 : vector<32x128xbf16>, vector<32x128xbf16>, vector<32x128xbf16>, vector<32x128xbf16>, vector<32x128xbf16>, vector<32x128xbf16>, vector<32x128xbf16>, vector<32x128xbf16> -> vector<256x128xbf16>
    %19 = vector.extract_strided_slice %1 {offsets = [0, 0], sizes = [96, 256], strides = [1, 1]} : vector<96x1280xbf16> to vector<96x256xbf16>
    %cst_10 = arith.constant dense<0.000000e+00> : vector<96x128xf32>
    %20 = tpu.matmul %19, %18, %cst_10 {dimension_numbers = #tpu.dot_dimension_numbers<[1], [0], [0], [1], [0, 0, 1, 1], [], []>} : vector<96x256xbf16>, vector<256x128xbf16>, vector<96x128xf32> -> vector<96x128xf32>
    %21 = vector.extract_strided_slice %9 {offsets = [0, 8], sizes = [32, 128], strides = [1, 1]} : vector<32x167xbf16> to vector<32x128xbf16>
    %22 = vector.extract_strided_slice %9 {offsets = [0, 9], sizes = [32, 128], strides = [1, 1]} : vector<32x167xbf16> to vector<32x128xbf16>
    %23 = vector.extract_strided_slice %9 {offsets = [0, 10], sizes = [32, 128], strides = [1, 1]} : vector<32x167xbf16> to vector<32x128xbf16>
    %24 = vector.extract_strided_slice %9 {offsets = [0, 11], sizes = [32, 128], strides = [1, 1]} : vector<32x167xbf16> to vector<32x128xbf16>
    %25 = vector.extract_strided_slice %9 {offsets = [0, 12], sizes = [32, 128], strides = [1, 1]} : vector<32x167xbf16> to vector<32x128xbf16>
    %26 = vector.extract_strided_slice %9 {offsets = [0, 13], sizes = [32, 128], strides = [1, 1]} : vector<32x167xbf16> to vector<32x128xbf16>
    %27 = vector.extract_strided_slice %9 {offsets = [0, 14], sizes = [32, 128], strides = [1, 1]} : vector<32x167xbf16> to vector<32x128xbf16>
    %28 = vector.extract_strided_slice %9 {offsets = [0, 15], sizes = [32, 128], strides = [1, 1]} : vector<32x167xbf16> to vector<32x128xbf16>
    %29 = tpu.concatenate %21, %22, %23, %24, %25, %26, %27, %28 in 0 : vector<32x128xbf16>, vector<32x128xbf16>, vector<32x128xbf16>, vector<32x128xbf16>, vector<32x128xbf16>, vector<32x128xbf16>, vector<32x128xbf16>, vector<32x128xbf16> -> vector<256x128xbf16>
    %30 = vector.extract_strided_slice %1 {offsets = [0, 256], sizes = [96, 256], strides = [1, 1]} : vector<96x1280xbf16> to vector<96x256xbf16>
    %cst_11 = arith.constant dense<0.000000e+00> : vector<96x128xf32>
    %31 = tpu.matmul %30, %29, %cst_11 {dimension_numbers = #tpu.dot_dimension_numbers<[1], [0], [0], [1], [0, 0, 1, 1], [], []>} : vector<96x256xbf16>, vector<256x128xbf16>, vector<96x128xf32> -> vector<96x128xf32>
    %32 = arith.addf %20, %31 : vector<96x128xf32>
    %33 = vector.extract_strided_slice %9 {offsets = [0, 16], sizes = [32, 128], strides = [1, 1]} : vector<32x167xbf16> to vector<32x128xbf16>
    %34 = vector.extract_strided_slice %9 {offsets = [0, 17], sizes = [32, 128], strides = [1, 1]} : vector<32x167xbf16> to vector<32x128xbf16>
    %35 = vector.extract_strided_slice %9 {offsets = [0, 18], sizes = [32, 128], strides = [1, 1]} : vector<32x167xbf16> to vector<32x128xbf16>
    %36 = vector.extract_strided_slice %9 {offsets = [0, 19], sizes = [32, 128], strides = [1, 1]} : vector<32x167xbf16> to vector<32x128xbf16>
    %37 = vector.extract_strided_slice %9 {offsets = [0, 20], sizes = [32, 128], strides = [1, 1]} : vector<32x167xbf16> to vector<32x128xbf16>
    %38 = vector.extract_strided_slice %9 {offsets = [0, 21], sizes = [32, 128], strides = [1, 1]} : vector<32x167xbf16> to vector<32x128xbf16>
    %39 = vector.extract_strided_slice %9 {offsets = [0, 22], sizes = [32, 128], strides = [1, 1]} : vector<32x167xbf16> to vector<32x128xbf16>
    %40 = vector.extract_strided_slice %9 {offsets = [0, 23], sizes = [32, 128], strides = [1, 1]} : vector<32x167xbf16> to vector<32x128xbf16>
    %41 = tpu.concatenate %33, %34, %35, %36, %37, %38, %39, %40 in 0 : vector<32x128xbf16>, vector<32x128xbf16>, vector<32x128xbf16>, vector<32x128xbf16>, vector<32x128xbf16>, vector<32x128xbf16>, vector<32x128xbf16>, vector<32x128xbf16> -> vector<256x128xbf16>
    %42 = vector.extract_strided_slice %1 {offsets = [0, 512], sizes = [96, 256], strides = [1, 1]} : vector<96x1280xbf16> to vector<96x256xbf16>
    %cst_12 = arith.constant dense<0.000000e+00> : vector<96x128xf32>
    %43 = tpu.matmul %42, %41, %cst_12 {dimension_numbers = #tpu.dot_dimension_numbers<[1], [0], [0], [1], [0, 0, 1, 1], [], []>} : vector<96x256xbf16>, vector<256x128xbf16>, vector<96x128xf32> -> vector<96x128xf32>
    %44 = arith.addf %32, %43 : vector<96x128xf32>
    %45 = vector.extract_strided_slice %9 {offsets = [0, 24], sizes = [32, 128], strides = [1, 1]} : vector<32x167xbf16> to vector<32x128xbf16>
    %46 = vector.extract_strided_slice %9 {offsets = [0, 25], sizes = [32, 128], strides = [1, 1]} : vector<32x167xbf16> to vector<32x128xbf16>
    %47 = vector.extract_strided_slice %9 {offsets = [0, 26], sizes = [32, 128], strides = [1, 1]} : vector<32x167xbf16> to vector<32x128xbf16>
    %48 = vector.extract_strided_slice %9 {offsets = [0, 27], sizes = [32, 128], strides = [1, 1]} : vector<32x167xbf16> to vector<32x128xbf16>
    %49 = vector.extract_strided_slice %9 {offsets = [0, 28], sizes = [32, 128], strides = [1, 1]} : vector<32x167xbf16> to vector<32x128xbf16>
    %50 = vector.extract_strided_slice %9 {offsets = [0, 29], sizes = [32, 128], strides = [1, 1]} : vector<32x167xbf16> to vector<32x128xbf16>
    %51 = vector.extract_strided_slice %9 {offsets = [0, 30], sizes = [32, 128], strides = [1, 1]} : vector<32x167xbf16> to vector<32x128xbf16>
    %52 = vector.extract_strided_slice %9 {offsets = [0, 31], sizes = [32, 128], strides = [1, 1]} : vector<32x167xbf16> to vector<32x128xbf16>
    %53 = tpu.concatenate %45, %46, %47, %48, %49, %50, %51, %52 in 0 : vector<32x128xbf16>, vector<32x128xbf16>, vector<32x128xbf16>, vector<32x128xbf16>, vector<32x128xbf16>, vector<32x128xbf16>, vector<32x128xbf16>, vector<32x128xbf16> -> vector<256x128xbf16>
    %54 = vector.extract_strided_slice %1 {offsets = [0, 768], sizes = [96, 256], strides = [1, 1]} : vector<96x1280xbf16> to vector<96x256xbf16>
    %cst_13 = arith.constant dense<0.000000e+00> : vector<96x128xf32>
    %55 = tpu.matmul %54, %53, %cst_13 {dimension_numbers = #tpu.dot_dimension_numbers<[1], [0], [0], [1], [0, 0, 1, 1], [], []>} : vector<96x256xbf16>, vector<256x128xbf16>, vector<96x128xf32> -> vector<96x128xf32>
    %56 = arith.addf %44, %55 : vector<96x128xf32>
    %57 = vector.extract_strided_slice %9 {offsets = [0, 32], sizes = [32, 128], strides = [1, 1]} : vector<32x167xbf16> to vector<32x128xbf16>
    %58 = vector.extract_strided_slice %9 {offsets = [0, 33], sizes = [32, 128], strides = [1, 1]} : vector<32x167xbf16> to vector<32x128xbf16>
    %59 = vector.extract_strided_slice %9 {offsets = [0, 34], sizes = [32, 128], strides = [1, 1]} : vector<32x167xbf16> to vector<32x128xbf16>
    %60 = vector.extract_strided_slice %9 {offsets = [0, 35], sizes = [32, 128], strides = [1, 1]} : vector<32x167xbf16> to vector<32x128xbf16>
    %61 = vector.extract_strided_slice %9 {offsets = [0, 36], sizes = [32, 128], strides = [1, 1]} : vector<32x167xbf16> to vector<32x128xbf16>
    %62 = vector.extract_strided_slice %9 {offsets = [0, 37], sizes = [32, 128], strides = [1, 1]} : vector<32x167xbf16> to vector<32x128xbf16>
    %63 = vector.extract_strided_slice %9 {offsets = [0, 38], sizes = [32, 128], strides = [1, 1]} : vector<32x167xbf16> to vector<32x128xbf16>
    %64 = vector.extract_strided_slice %9 {offsets = [0, 39], sizes = [32, 128], strides = [1, 1]} : vector<32x167xbf16> to vector<32x128xbf16>
    %65 = tpu.concatenate %57, %58, %59, %60, %61, %62, %63, %64 in 0 : vector<32x128xbf16>, vector<32x128xbf16>, vector<32x128xbf16>, vector<32x128xbf16>, vector<32x128xbf16>, vector<32x128xbf16>, vector<32x128xbf16>, vector<32x128xbf16> -> vector<256x128xbf16>
    %66 = vector.extract_strided_slice %1 {offsets = [0, 1024], sizes = [96, 256], strides = [1, 1]} : vector<96x1280xbf16> to vector<96x256xbf16>
    %cst_14 = arith.constant dense<0.000000e+00> : vector<96x128xf32>
    %67 = tpu.matmul %66, %65, %cst_14 {dimension_numbers = #tpu.dot_dimension_numbers<[1], [0], [0], [1], [0, 0, 1, 1], [], []>} : vector<96x256xbf16>, vector<256x128xbf16>, vector<96x128xf32> -> vector<96x128xf32>
    %68 = arith.addf %56, %67 : vector<96x128xf32>
    %69 = vector.extract_strided_slice %6 {offsets = [0, 19], sizes = [4, 128], strides = [1, 1]} : vector<4x167xf32> to vector<4x128xf32>
    %70 = vector.extract_strided_slice %6 {offsets = [0, 18], sizes = [4, 128], strides = [1, 1]} : vector<4x167xf32> to vector<4x128xf32>
    %71 = arith.maximumf %70, %69 : vector<4x128xf32>
    %72 = vector.extract_strided_slice %6 {offsets = [0, 20], sizes = [4, 128], strides = [1, 1]} : vector<4x167xf32> to vector<4x128xf32>
    %73 = arith.maximumf %71, %72 : vector<4x128xf32>
    %74 = arith.truncf %73 : vector<4x128xf32> to vector<4x128xbf16>
    %cst_15 = arith.constant dense<0.000000e+00> : vector<32x128xf32>
    %75 = tpu.matmul %2, %74, %cst_15 {dimension_numbers = #tpu.dot_dimension_numbers<[1], [0], [0], [1], [0, 0, 1, 1], [], []>} : vector<32x4xbf16>, vector<4x128xbf16>, vector<32x128xf32> -> vector<32x128xf32>
    %76 = tpu.concatenate %68, %75 in 0 : vector<96x128xf32>, vector<32x128xf32> -> vector<128x128xf32>
    %c0_16 = arith.constant 0 : index
    %c0_17 = arith.constant 0 : index
    %c0_18 = arith.constant 0 : index
    %77 = vector.load %arg5[%c0_16, %c0_17, %c0_18] : memref<1x128x128xf32, #tpu.memory_space<vmem>>, vector<1x128x128xf32>
    %78 = vector.shape_cast %77 : vector<1x128x128xf32> to vector<128x128xf32>
    %79 = vector.shape_cast %76 : vector<128x128xf32> to vector<1x128x128xf32>
    tpu.vector_store %arg5[%c0_16, %c0_17, %c0_18], %79 {strides = array<i32>} : memref<1x128x128xf32, #tpu.memory_space<vmem>>, vector<1x128x128xf32>,
    %cst_19 = arith.constant dense<0.000000e+00> : vector<128xf32>
    %80 = vector.multi_reduction <add>, %76, %cst_19 [1] : vector<128x128xf32> to vector<128xf32>
    %81 = vector.shape_cast %80 : vector<128xf32> to vector<128x1xf32>
    %82 = arith.addf %3, %81 : vector<128x1xf32>
    %83 = arith.mulf %76, %76 : vector<128x128xf32>
    %cst_20 = arith.constant dense<0.000000e+00> : vector<128xf32>
    %84 = vector.multi_reduction <add>, %83, %cst_20 [1] : vector<128x128xf32> to vector<128xf32>
    %85 = vector.shape_cast %84 : vector<128xf32> to vector<128x1xf32>
    %86 = arith.addf %4, %85 : vector<128x1xf32>
    %87 = tpu.concatenate %82, %86 in 0 : vector<128x1xf32>, vector<128x1xf32> -> vector<256x1xf32>
    %c0_21 = arith.constant 0 : index
    %c0_22 = arith.constant 0 : index
    %c0_23 = arith.constant 0 : index
    %88 = vector.load %arg6[%c0_21, %c0_22, %c0_23] : memref<1x256x1xf32, #tpu.memory_space<vmem>>, vector<1x256x1xf32>
    %89 = vector.shape_cast %88 : vector<1x256x1xf32> to vector<256x1xf32>
    %90 = vector.shape_cast %87 : vector<256x1xf32> to vector<1x256x1xf32>
    tpu.vector_store %arg6[%c0_21, %c0_22, %c0_23], %90 {strides = array<i32>} : memref<1x256x1xf32, #tpu.memory_space<vmem>>, vector<1x256x1xf32>,
    return
  }
  func.func @transform_0(%arg0: i32) -> (i32, i32, i32) {
    %c0_i32 = arith.constant 0 : i32
    %c0_i32_0 = arith.constant 0 : i32
    %c0_i32_1 = arith.constant 0 : i32
    return %arg0, %c0_i32, %c0_i32_0 : i32, i32, i32
  }
  func.func @transform_1(%arg0: i32) -> (i32, i32) {
    %c0_i32 = arith.constant 0 : i32
    %c0_i32_0 = arith.constant 0 : i32
    %c0_i32_1 = arith.constant 0 : i32
    return %c0_i32, %c0_i32_0 : i32, i32
  }
  func.func @transform_2(%arg0: i32) -> (i32, i32) {
    %c0_i32 = arith.constant 0 : i32
    %c0_i32_0 = arith.constant 0 : i32
    %c0_i32_1 = arith.constant 0 : i32
    return %c0_i32, %c0_i32_0 : i32, i32
  }
  func.func @transform_3(%arg0: i32) -> (i32, i32) {
    %c0_i32 = arith.constant 0 : i32
    %c0_i32_0 = arith.constant 0 : i32
    %c0_i32_1 = arith.constant 0 : i32
    return %c0_i32, %c0_i32_0 : i32, i32
  }
  func.func @transform_4(%arg0: i32) -> (i32, i32, i32) {
    %c0_i32 = arith.constant 0 : i32
    %c0_i32_0 = arith.constant 0 : i32
    %c0_i32_1 = arith.constant 0 : i32
    return %arg0, %c0_i32, %c0_i32_0 : i32, i32, i32
  }
  func.func @transform_5(%arg0: i32) -> (i32, i32, i32) {
    %c0_i32 = arith.constant 0 : i32
    %c0_i32_0 = arith.constant 0 : i32
    %c0_i32_1 = arith.constant 0 : i32
    return %arg0, %c0_i32, %c0_i32_0 : i32, i32, i32
  }
}

</mosaic_0001>

<bundles_post_ra>
// kernel: inception_forward.3
= control target key start
LH: loop header
LB: loop body
LE: loop exit
PB: predicated region body
PF: predicated region fallthrough
CT: control target
= control target key end

     0   :  { %8 = vsyncpa [#allocation3], 0  ;;  %s902_s0 = inlined_call_operand.vmem [shape: f32[2,128,128], index: 0, kind: input, shape index: {}]   ;;  %s903_s1 = inlined_call_operand.vmem [shape: f32[128,1], index: 1, kind: input, shape index: {}]   ;;  %s904_s2 = inlined_call_operand.vmem [shape: f32[128,1], index: 2, kind: input, shape index: {}]   ;;  %s905_s3 = inlined_call_operand.hbm [shape: f32[2,128,128], index: 3, kind: output, shape index: {}]  }
   0x1   :  { %10 = vsyncpa [#allocation3 + $0x1], 0  ;;  %s665_s12 = smov 0   ;;  %s667_s13 = smov 0  }
   0x2   :  { %s669_s14 = smov 0   ;;  %s671_s15 = smov 0  }
   0x3 LB: > { %s686_s16 = sadd.s32 4294967295, %s640_s15   ;;  %s519_s17 = sadd.s32 4294967294, %s640_s15   ;;  %s640_s15 = sphi %s671_s15, %s911_s15   ;;  %s636_s14 = sphi %s669_s14, %s910_s14   ;;  %s632_s13 = sphi %s667_s13, %s909_s13   ;;  %s628_s12 = sphi %s665_s12, %s908_s12  }
   0x4   : > { %s690_s18 = sadd.s32 1, %s640_s15   ;;  %s91_s19 = sadd.s32 1, %s636_s14 }
   0x5   : > { %s88_s20 = ssub.s32 %s640_s15, %s690_s18  ;;  %p101_p0 = scmp.ne.s32.totalorder %s636_s14, %s632_s13 }
   0x6   : > { %p89_p1 = scmp.eq.s32.totalorder %s88_s20, 0  ;;  %p102_p2 = scmp.eq.s32.totalorder %s686_s16, 1 }
   0x7   : > { %p107_p3 = scmp.ne.s32.totalorder %s632_s13, %s628_s12  ;;  %p108_p4 = scmp.eq.s32.totalorder %s519_s17, 1 }
   0x8   : > { %s701_s21 = scalar_select %p89_p1, %s636_s14, %s91_s19  }
   0x9   : > { %p703_p5 = por %p102_p2, %p101_p0  ;;  %p707_p6 = por %p108_p4, %p107_p3 }
   0xa   : > { %p522_p7 = scmp.ge.s32.totalorder %s640_s15, 1  ;;  %p140_p8 = scmp.lt.s32.totalorder %s640_s15, 3 }
   0xc   : > { %p141_p9 = pnand %p522_p7, %p140_p8 }
   0xd   : > { %p164_p10 = scmp.lt.s32.totalorder (!%p141_p9), %s686_s16, 1  ;;  %s161_s17 = sand.u32 (!%p141_p9), 1, %s632_s13  }
   0xe   : > { %144 = sbr.rel (%p141_p9) target bundleno = 226 (0xe2), region = 32  ;;  %s523_s19 = sshll.u32 (!%p141_p9), %s161_s17, 7 }
   0xf   : > { %s829_s20 = scalar_lea.vmem (!%p141_p9), [#allocation2], %s523_s19  ;;  %s532_s24 = sshll.u32 (!%p141_p9), %s686_s16, 7 }
  0x10   : > { %s453_s27 = scalar_lea.hbm (!%p141_p9), %s905_s3, %s532_s24  ;;  %s442_s29 = scalar_lea.sflag (!%p141_p9), [#allocation3], %s161_s17 }
  0x11   : > { %s456_s28 = sshll.u32 (!%p141_p9), %s453_s27, 4  ;;  %s457_s28 = int_to_ptr.hbm [resolvable:$true] %s456_s28 }
  0x12   : > { %s592_s30 = sshra.s32 (!%p141_p9), %s457_s28, 4  ;;  %s593_s30 = int_to_ptr.hbm [resolvable:$true] %s592_s30 }
  0x13   : > { %v173_v0 = vld [vmem:[%s903_s1 + $0x20] sm:$0xff]  ;;  %v171_v1 = vld [vmem:[%s903_s1 + $0x10] sm:$0xff]  ;;  %v642_v3 = vmov 0   ;;  %v174_v4 = vld [vmem:[%s903_s1 + $0x28] sm:$0xff]  ;;  %s165_s7 = scalar_select %p164_p10, %s686_s16, 1 }
  0x14   : > { %v169_v2 = vld [vmem:[%s903_s1] sm:$0xff]  ;;  %577 = vset.pattern.permute.xlu2 %v642_v3  ;;  %576 = vset.pattern.permute.xlu1 %v642_v3  ;;  %v172_v5 = vld [vmem:[%s903_s1 + $0x18] sm:$0xff]  ;;  %v170_v6 = vld [vmem:[%s903_s1 + $0x8] sm:$0xff]  ;;  %s454_s16 = sshll.u32 %s829_s20, 4  ;;  %s594_s4 = scalar_lea.hbm %s593_s30, 128  ;;  %s455_s16 = int_to_ptr.vmem [resolvable:$true] %s454_s16 }
  0x15   : > { %575 = vset.pattern.permute.xlu0 %v642_v3  ;;  %239 = vperm.xlu2 %577, %v173_v0   ;;  %v177_v7 = vld [vmem:[%s903_s1 + $0x40] sm:$0xff]  ;;  %v176_v8 = vld [vmem:[%s903_s1 + $0x38] sm:$0xff]  ;;  %v175_v9 = vld [vmem:[%s903_s1 + $0x30] sm:$0xff]  ;;  %s531_s8 = sshll.u32 %s165_s7, 7  ;;  %p595_p11 = scmp.ne.s32.totalorder %s593_s30, %s594_s4 }
  0x16   : > { %229 = vperm.xlu1 %576, %v171_v1   ;;  %219 = vperm.xlu0 %575, %v169_v2   ;;  %v180_v10 = vld [vmem:[%s903_s1 + $0x58] sm:$0xff]  ;;  %v179_v11 = vld [vmem:[%s903_s1 + $0x50] sm:$0xff]  ;;  %v178_v12 = vld [vmem:[%s903_s1 + $0x48] sm:$0xff]  ;;  %s822_s11 = scalar_lea.vmem %s902_s0, %s531_s8  ;;  %s598_s7 = scalar_lea.hbm %s905_s3, 256 }
  0x17   : > { %v183_v13 = vld [vmem:[%s903_s1 + $0x70] sm:$0xff]  ;;  %v182_v14 = vld [vmem:[%s903_s1 + $0x68] sm:$0xff]  ;;  %v181_v15 = vld [vmem:[%s903_s1 + $0x60] sm:$0xff]  ;;  %p596_p12 = pnand %p595_p11, %p703_p5  ;;  %p599_p0 = scmp.lt.s32.totalorder %s593_s30, %s905_s3 }
  0x18   : > { %v186_v16 = vld [vmem:[%s904_s2 + $0x8] sm:$0xff]  ;;  %v185_v17 = vld [vmem:[%s904_s2] sm:$0xff]  ;;  %v184_v18 = vld [vmem:[%s903_s1 + $0x78] sm:$0xff]  ;;  %p600_p1 = scmp.lt.s32.totalorder %s598_s7, %s594_s4 }
  0x19   : > { %v189_v19 = vld [vmem:[%s904_s2 + $0x20] sm:$0xff]  ;;  %v188_v20 = vld [vmem:[%s904_s2 + $0x18] sm:$0xff]  ;;  %v187_v21 = vld [vmem:[%s904_s2 + $0x10] sm:$0xff]  ;;  %p597_p13 = pneg %p596_p12 }
  0x1a   : > { %v192_v22 = vld [vmem:[%s904_s2 + $0x38] sm:$0xff]  ;;  %v191_v23 = vld [vmem:[%s904_s2 + $0x30] sm:$0xff]  ;;  %v190_v24 = vld [vmem:[%s904_s2 + $0x28] sm:$0xff]  ;;  %p601_p2 = por %p600_p1, %p599_p0 }
  0x1b   : > { %v195_v25 = vld [vmem:[%s904_s2 + $0x50] sm:$0xff]  ;;  %v194_v26 = vld [vmem:[%s904_s2 + $0x48] sm:$0xff]  ;;  %v193_v27 = vld [vmem:[%s904_s2 + $0x40] sm:$0xff] }
  0x1c   : > { %v198_v28 = vld [vmem:[%s904_s2 + $0x68] sm:$0xff]  ;;  %v197_v29 = vld [vmem:[%s904_s2 + $0x60] sm:$0xff]  ;;  %v196_v30 = vld [vmem:[%s904_s2 + $0x58] sm:$0xff]  ;;  %p602_p3 = pnand %p601_p2, %p597_p13 }
  0x1d   : > { %244 = vperm.xlu2 %577, %v174_v4   ;;  %v200_v31 = vld [vmem:[%s904_s2 + $0x78] sm:$0xff]  ;;  %v199_v32 = vld [vmem:[%s904_s2 + $0x70] sm:$0xff]  ;;  %v202_v42 = vld [vmem:[%s822_s11 + $0x8] sm:$0xff] }
  0x1e   : > { %234 = vperm.xlu1 %576, %v172_v5   ;;  %224 = vperm.xlu0 %575, %v170_v6   ;;  %v205_v49 = vld [vmem:[%s822_s11 + $0x20] sm:$0xff]  ;;  %v208_v56 = vld [vmem:[%s822_s11 + $0x38] sm:$0xff]  ;;  %v211_v63 = vld [vmem:[%s822_s11 + $0x50] sm:$0xff] }
  0x1f   : > { %v201_v0 = vld [vmem:[%s822_s11] sm:$0xff] }
  0x25   : > { %259 = vperm.xlu2 %577, %v177_v7  }
  0x26   : > { %254 = vperm.xlu1 %576, %v176_v8   ;;  %249 = vperm.xlu0 %575, %v175_v9   ;;  %v214_v9 = vld [vmem:[%s822_s11 + $0x68] sm:$0xff] }
  0x2d   : > { %274 = vperm.xlu2 %577, %v180_v10  }
  0x2e   : > { %269 = vperm.xlu1 %576, %v179_v11   ;;  %264 = vperm.xlu0 %575, %v178_v12   ;;  %v203_v11 = vld [vmem:[%s822_s11 + $0x10] sm:$0xff]  ;;  %v204_v12 = vld [vmem:[%s822_s11 + $0x18] sm:$0xff] }
  0x35   : > { %289 = vperm.xlu2 %577, %v183_v13  }
  0x36   : > { %284 = vperm.xlu1 %576, %v182_v14   ;;  %279 = vperm.xlu0 %575, %v181_v15  }
  0x3d   : > { %320 = vperm.xlu2 %577, %v186_v16  }
  0x3e   : > { %315 = vperm.xlu1 %576, %v185_v17   ;;  %294 = vperm.xlu0 %575, %v184_v18  }
  0x45   : > { %335 = vperm.xlu2 %577, %v189_v19  }
  0x46   : > { %330 = vperm.xlu1 %576, %v188_v20   ;;  %325 = vperm.xlu0 %575, %v187_v21  }
  0x4d   : > { %350 = vperm.xlu2 %577, %v192_v22  }
  0x4e   : > { %345 = vperm.xlu1 %576, %v191_v23   ;;  %340 = vperm.xlu0 %575, %v190_v24  }
  0x55   : > { %365 = vperm.xlu2 %577, %v195_v25   ;;  %v206_v25 = vld [vmem:[%s822_s11 + $0x28] sm:$0xff] }
  0x56   : > { %360 = vperm.xlu1 %576, %v194_v26   ;;  %355 = vperm.xlu0 %575, %v193_v27   ;;  %v207_v26 = vld [vmem:[%s822_s11 + $0x30] sm:$0xff] }
  0x5d   : > { %380 = vperm.xlu2 %577, %v198_v28  }
  0x5e   : > { %375 = vperm.xlu1 %576, %v197_v29   ;;  %370 = vperm.xlu0 %575, %v196_v30  }
  0x66   : > { %390 = vperm.xlu1 %576, %v200_v31   ;;  %385 = vperm.xlu0 %575, %v199_v32  }
  0x6f   : > { %v240_v33 = vpop.permute.xlu2 %239 }
  0x70   : > { %v301_v50 = vmul.f32 %v240_v33, %v205_v49  ;;  %v213_v49 = vld [vmem:[%s822_s11 + $0x60] sm:$0xff] }
  0x77   : > { %v809_v34 = vpop.permute.xlu2 %244 }
  0x78   : > { %v302_v27 = vmul.f32 %v809_v34, %v206_v25 }
  0x7f   : > { %v811_v35 = vpop.permute.xlu2 %259 }
  0x87   : > { %v814_v36 = vpop.permute.xlu2 %274 }
  0x88   : > { %v230_v37 = vpop.permute.xlu1 %229  ;;  %v220_v38 = vpop.permute.xlu0 %219 }
  0x89   : > { %v297_v2 = vmul.f32 %v220_v38, %v201_v0  ;;  %v299_v14 = vmul.f32 %v230_v37, %v203_v11  ;;  %v209_v38 = vld [vmem:[%s822_s11 + $0x40] sm:$0xff] }
  0x8f   : > { %v817_v39 = vpop.permute.xlu2 %289 }
  0x90   : > { %v235_v40 = vpop.permute.xlu1 %234  ;;  %v225_v41 = vpop.permute.xlu0 %224 }
  0x91   : > { %v298_v43 = vmul.f32 %v225_v41, %v202_v42  ;;  %v300_v15 = vmul.f32 %v235_v40, %v204_v12  ;;  %v210_v40 = vld [vmem:[%s822_s11 + $0x48] sm:$0xff]  ;;  %v305_v41 = vmul.f32 %v811_v35, %v209_v38 }
  0x97   : > { %v321_v44 = vpop.permute.xlu2 %320 }
  0x98   : > { %v394_v45 = vadd.f32 %v321_v44, %v298_v43  ;;  %v255_v46 = vpop.permute.xlu1 %254  ;;  %v250_v47 = vpop.permute.xlu0 %249 }
  0x99   : > { %v304_v57 = vmul.f32 %v255_v46, %v208_v56  ;;  %v303_v28 = vmul.f32 %v250_v47, %v207_v26 }
  0x9a   : > { %v410_v48 = vmax.f32 %v394_v45, 0.0 }
  0x9c   : > { %426 = vst [vmem:[%s829_s20 + $0x8] sm:$0xff] %v410_v48  ;;  %v212_v48 = vld [vmem:[%s822_s11 + $0x58] sm:$0xff] }
  0x9f   : > { %v336_v51 = vpop.permute.xlu2 %335 }
  0xa0   : > { %v397_v52 = vadd.f32 %v336_v51, %v301_v50  ;;  %v270_v53 = vpop.permute.xlu1 %269  ;;  %v265_v54 = vpop.permute.xlu0 %264  ;;  %v308_v50 = vmul.f32 %v814_v36, %v212_v48 }
  0xa1   : > { %v307_v1 = vmul.f32 %v270_v53, %v211_v63  ;;  %v306_v42 = vmul.f32 %v265_v54, %v210_v40 }
  0xa2   : > { %v413_v55 = vmax.f32 %v397_v52, 0.0 }
  0xa4   : > { %429 = vst [vmem:[%s829_s20 + $0x20] sm:$0xff] %v413_v55 }
  0xa7   : > { %v351_v58 = vpop.permute.xlu2 %350 }
  0xa8   : > { %v400_v59 = vadd.f32 %v351_v58, %v304_v57  ;;  %v285_v60 = vpop.permute.xlu1 %284  ;;  %v280_v61 = vpop.permute.xlu0 %279  ;;  %v215_v57 = vld [vmem:[%s822_s11 + $0x70] sm:$0xff]  ;;  %v216_v58 = vld [vmem:[%s822_s11 + $0x78] sm:$0xff] }
  0xa9   : > { %v310_v13 = vmul.f32 %v285_v60, %v214_v9  ;;  %v309_v51 = vmul.f32 %v280_v61, %v213_v49  ;;  %v311_v36 = vmul.f32 %v817_v39, %v215_v57 }
  0xaa   : > { %v416_v62 = vmax.f32 %v400_v59, 0.0 }
  0xac   : > { %432 = vst [vmem:[%s829_s20 + $0x38] sm:$0xff] %v416_v62 }
  0xaf   : > { %v366_v3 = vpop.permute.xlu2 %365 }
  0xb0   : > { %v403_v4 = vadd.f32 %v366_v3, %v307_v1  ;;  %v316_v5 = vpop.permute.xlu1 %315  ;;  %v837_v6 = vpop.permute.xlu0 %294 }
  0xb1   : > { %v393_v7 = vadd.f32 %v316_v5, %v297_v2  ;;  %v312_v59 = vmul.f32 %v837_v6, %v216_v58 }
  0xb2   : > { %v419_v8 = vmax.f32 %v403_v4, 0.0 }
  0xb3   : > { %v409_v10 = vmax.f32 %v393_v7, 0.0 }
  0xb4   : > { %435 = vst [vmem:[%s829_s20 + $0x50] sm:$0xff] %v419_v8 }
  0xb5   : > { %425 = vst [vmem:[%s829_s20] sm:$0xff] %v409_v10 }
  0xb7   : > { %v381_v16 = vpop.permute.xlu2 %380 }
  0xb8   : > { %v406_v17 = vadd.f32 %v381_v16, %v310_v13  ;;  %v331_v18 = vpop.permute.xlu1 %330  ;;  %v326_v19 = vpop.permute.xlu0 %325 }
  0xb9   : > { %v396_v20 = vadd.f32 %v331_v18, %v300_v15  ;;  %v395_v21 = vadd.f32 %v326_v19, %v299_v14 }
  0xba   : > { %v422_v22 = vmax.f32 %v406_v17, 0.0 }
  0xbb   : > { %v412_v23 = vmax.f32 %v396_v20, 0.0  ;;  %v411_v24 = vmax.f32 %v395_v21, 0.0 }
  0xbc   : > { %438 = vst [vmem:[%s829_s20 + $0x68] sm:$0xff] %v422_v22 }
  0xbd   : > { %428 = vst [vmem:[%s829_s20 + $0x18] sm:$0xff] %v412_v23 }
  0xbe   : > { %427 = vst [vmem:[%s829_s20 + $0x10] sm:$0xff] %v411_v24 }
  0xc0   : > { %v346_v29 = vpop.permute.xlu1 %345  ;;  %v341_v30 = vpop.permute.xlu0 %340 }
  0xc1   : > { %v399_v31 = vadd.f32 %v346_v29, %v303_v28  ;;  %v398_v32 = vadd.f32 %v341_v30, %v302_v27 }
  0xc3   : > { %v415_v33 = vmax.f32 %v399_v31, 0.0  ;;  %v414_v37 = vmax.f32 %v398_v32, 0.0 }
  0xc5   : > { %431 = vst [vmem:[%s829_s20 + $0x30] sm:$0xff] %v415_v33 }
  0xc6   : > { %430 = vst [vmem:[%s829_s20 + $0x28] sm:$0xff] %v414_v37 }
  0xc8   : > { %v361_v43 = vpop.permute.xlu1 %360  ;;  %v356_v34 = vpop.permute.xlu0 %355 }
  0xc9   : > { %v402_v44 = vadd.f32 %v361_v43, %v306_v42  ;;  %v401_v45 = vadd.f32 %v356_v34, %v305_v41 }
  0xcb   : > { %v418_v46 = vmax.f32 %v402_v44, 0.0  ;;  %v417_v47 = vmax.f32 %v401_v45, 0.0 }
  0xcd   : > { %434 = vst [vmem:[%s829_s20 + $0x48] sm:$0xff] %v418_v46 }
  0xce   : > { %433 = vst [vmem:[%s829_s20 + $0x40] sm:$0xff] %v417_v47 }
  0xd0   : > { %v376_v35 = vpop.permute.xlu1 %375  ;;  %v371_v52 = vpop.permute.xlu0 %370 }
  0xd1   : > { %v405_v53 = vadd.f32 %v376_v35, %v309_v51  ;;  %v404_v54 = vadd.f32 %v371_v52, %v308_v50 }
  0xd3   : > { %v421_v55 = vmax.f32 %v405_v53, 0.0  ;;  %v420_v56 = vmax.f32 %v404_v54, 0.0 }
  0xd5   : > { %437 = vst [vmem:[%s829_s20 + $0x60] sm:$0xff] %v421_v55 }
  0xd6   : > { %436 = vst [vmem:[%s829_s20 + $0x58] sm:$0xff] %v420_v56 }
  0xd8   : > { %v391_v60 = vpop.permute.xlu1 %390  ;;  %v386_v61 = vpop.permute.xlu0 %385 }
  0xd9   : > { %v408_v62 = vadd.f32 %v391_v60, %v312_v59  ;;  %v407_v63 = vadd.f32 %v386_v61, %v311_v36 }
  0xdb   : > { %v424_v0 = vmax.f32 %v408_v62, 0.0  ;;  %v423_v1 = vmax.f32 %v407_v63, 0.0 }
  0xdd   : > { %440 = vst [vmem:[%s829_s20 + $0x78] sm:$0xff] %v424_v0 }
  0xde   : > { %439 = vst [vmem:[%s829_s20 + $0x70] sm:$0xff] %v423_v1 }
  0xdf   : > { %605 = shalt.err (!%p602_p3)
}
  0xe0   : > { %s643_s10 = smov 128   ;;  %s644_s11 = smov 8  }
  0xe1   : > { %533 = dma.vmem_to_hbm [thread:$0]  (%p703_p5), %s455_s16, 2048, %s457_s28, %s442_s29, %s643_s10, %s643_s10, %s644_s11  }
  0xe2 PF: > { %p539_p4 = scmp.ge.s32.totalorder %s640_s15, 2  ;;  %s471_s17 = sand.u32 1, %s628_s12  }
  0xe3   : > { %s472_s19 = scalar_lea.sflag [#allocation3], %s471_s17 }
  0xe4   : > { %p536_p7 = pnand %p539_p4, %p707_p6 }
  0xe6   : > { %p537_p8 = pneg %p536_p7 }
  0xe8   : > { %623 = dma.done.wait (%p537_p8), %s472_s19, 2048  }
  0xe9   : > { %625 = vsyncadd (%p537_p8), %s472_s19, 4294965248  ;;  %p13_p9 = scmp.ge.s32.totalorder %s690_s18, 4   ;;  %s908_s12 = smov %s632_s13 }
  0xea   : > { %s909_s13 = smov %s636_s14  ;;  %s910_s14 = smov %s701_s21 }
  0xeb   : > { %s911_s15 = smov %s690_s18  ;;  %15 = sbr.rel (!%p13_p9) target bundleno = 3 (0x3), region = 67 }
  0xf0   :  { %478 = vsyncpa [#allocation3], 1 }
  0xf1   :  { %480 = vsyncpa [#allocation3 + $0x1], 1 }

// kernel: inception_forward.2
= control target key start
LH: loop header
LB: loop body
LE: loop exit
PB: predicated region body
PF: predicated region fallthrough
CT: control target
= control target key end

     0   :  { %s2351_s18 = smov 0   ;;  %s3642_s0 = inlined_call_operand.vmem [shape: f32[2,4,167], index: 0, kind: input, shape index: {}]   ;;  %s3643_s1 = inlined_call_operand.vmem [shape: bf16[32,4], index: 1, kind: input, shape index: {}]   ;;  %s3644_s2 = inlined_call_operand.vmem [shape: bf16[96,1280], index: 2, kind: input, shape index: {}]   ;;  %s3645_s3 = inlined_call_operand.vmem [shape: bf16[32,4], index: 3, kind: input, shape index: {}]   ;;  %s3646_s4 = inlined_call_operand.vmem [shape: f32[2,128,128], index: 4, kind: output, shape index: {0}]   ;;  %s3647_s5 = inlined_call_operand.vmem [shape: f32[2,256,1], index: 5, kind: output, shape index: {1}]  }
   0x1 LB: > { %s1922_s19 = sadd.s32 4294967295, %s2307_s18   ;;  %p1926_p0 = scmp.ge.s32.totalorder %s2307_s18, 1  ;;  %s2307_s18 = sphi %s2351_s18, %s16_s18  }
   0x2   : > { %p190_p1 = scmp.lt.s32.totalorder %s2307_s18, 3 }
   0x4   : > { %p191_p2 = pnand %p1926_p0, %p190_p1 }
   0x6   : > { %194 = sbr.rel (%p191_p2) target bundleno = 1176 (0x498), region = 36 }
   0xb   : > { %p223_p3 = scmp.lt.s32.totalorder %s1922_s19, 1  ;;  %vm333_vm0 = vcmask 1041408   ;;  %v2200_v7 = vld [vmem:[%s3643_s1] sm:$0xff]  ;;  %vm326_vm1 = vcmask 31744   ;;  %v2201_v8 = vld [vmem:[%s3643_s1 + $0x8] sm:$0xff]  ;;  %s2309_s28 = smov 124  }
   0xc   : > { %s2310_s29 = smov 126   ;;  %s2311_s30 = smov 127   ;;  %vm434_vm2 = vcmask 1022976   ;;  %vm460_vm3 = vcmask 1006592   ;;  %vm447_vm4 = vcmask 1014784   ;;  %vm486_vm5 = vcmask 990208  }
   0xd   : > { %s3679_s19 = smov (!%p223_p3, %s1922_s19), 1  ;;  %s2312_s6 = smov 123   ;;  %vm473_vm6 = vcmask 998400   ;;  %vm421_vm7 = vcmask 1031168   ;;  %vm408_vm8 = vcmask 1039360   ;;  %vm988_vm9 = vcmask 916480  }
   0xe   : > { %s2197_s20 = sshll.u32 %s3679_s19, 3  ;;  %s2313_s7 = smov 121   ;;  %vm615_vm10 = vcmask 982016   ;;  %vm1235_vm11 = vcmask 850944   ;;  %vm1482_vm12 = vcmask 785408   ;;  %vm1643_vm13 = vcmask 900096  }
   0xf   : > { %s227_s23 = scalar_lea.vmem %s3642_s0, %s2197_s20  ;;  %s2314_s8 = smov 125   ;;  %vm1801_vm14 = vcmask 7168  }
  0x10   : > { %v2365_v0 = vld [vmem:[%s227_s23] sm:$0xff]  ;;  %s2315_s9 = smov 120   ;;  %s2316_s10 = smov 112  }
  0x11   : > { %309 = vst [vmem:[#allocation1] ss:$2 sm:$0xff] %v2365_v0  ;;  %s2317_s11 = smov 122   ;;  %s2318_s12 = smov 104  }
  0x12   : > { %s2319_s13 = smov 96   ;;  %s2320_s26 = smov 110  }
  0x18   : > { %v310_v1 = vld.sshfl [vmem:[#allocation1] sm:$0xff pattern:$0x75316420]  ;;  %v311_v2 = vld.sshfl [vmem:[#allocation1 + $0x8] sm:$0xff pattern:$0x75316420] }
  0x19   : > { %v314_v3 = vpack.c.bf16 %v310_v1, %v310_v1  ;;  %v315_v4 = vpack.c.bf16 %v311_v2, %v311_v2 }
  0x1b   : > { %v335_v5 = vsel %vm333_vm0, %v314_v3, 0  ;;  %v338_v6 = vsel %vm333_vm0, %v315_v4, 0 }
  0x1c   : > { %347 = vmatpush.bf16.msra.mxu0 %v335_v5  ;;  %366 = vmatpush.bf16.msra.mxu1 %v338_v6 }
  0x1f   : > { %1941 = vmatmul.msk.bf16.vlgmr.msra.gmra.mxu0 %vm326_vm1, %v2200_v7  ;;  %1943 = vmatmul.msk.bf16.vlgmr.msra.gmra.mxu1 %vm326_vm1, %v2200_v7 }
  0x2f   : > { %1942 = vmatmul.msk.bf16.gmra.mxu0 %vm326_vm1, %v2201_v8  ;;  %1944 = vmatmul.msk.bf16.gmra.mxu1 %vm326_vm1, %v2201_v8 }
  0x9c   : > { %v349_v9 = vpop.f32.mrf.mxu0  ;;  %v368_v10 = vpop.f32.mrf.mxu1 }
  0x9d   : > { %v378_v11 = vpack.c.bf16 %v368_v10, %v349_v9 }
  0x9f   : > { %v386_v15 = vunpack.c.l.b16 %v378_v11  ;;  %v394_v16 = vunpack.c.h.b16 %v378_v11 }
  0xa4   : > { %v351_v12 = vpop.f32.mrf.mxu0  ;;  %v370_v13 = vpop.f32.mrf.mxu1 }
  0xa5   : > { %v379_v14 = vpack.c.bf16 %v370_v13, %v351_v12 }
  0xa7   : > { %v387_v17 = vunpack.c.l.b16 %v379_v14  ;;  %v395_v18 = vunpack.c.h.b16 %v379_v14 }
  0xa9   : > { %v2380_v19 = vpack.c.b16 %v387_v17, %v386_v15  ;;  %v2382_v20 = vpack.c.b16 %v395_v18, %v394_v16 }
  0xab   : > { %441 = vrot.lane.b32.xlu1 %v2382_v20, %s2309_s28  ;;  %413 = vrot.lane.b32.xlu2 %v2380_v19, %s2310_s29 }
  0xac   : > { %400 = vrot.lane.b32.xlu0 %v2380_v19, %s2311_s30  ;;  %v354_v21 = vpop.f32.mrf.mxu0  ;;  %v373_v22 = vpop.f32.mrf.mxu1 }
  0xad   : > { %v380_v25 = vpack.c.bf16 %v373_v22, %v354_v21 }
  0xaf   : > { %v388_v27 = vunpack.c.l.b16 %v380_v25  ;;  %v396_v30 = vunpack.c.h.b16 %v380_v25 }
  0xb3   : > { %452 = vrot.lane.b32.xlu1 %v2380_v19, %s2312_s6  ;;  %415 = vrot.lane.b32.xlu2 %v2382_v20, %s2310_s29 }
  0xb4   : > { %402 = vrot.lane.b32.xlu0 %v2382_v20, %s2311_s30  ;;  %v356_v23 = vpop.f32.mrf.mxu0  ;;  %v375_v24 = vpop.f32.mrf.mxu1 }
  0xb5   : > { %v381_v26 = vpack.c.bf16 %v375_v24, %v356_v23 }
  0xb7   : > { %v389_v28 = vunpack.c.l.b16 %v381_v26  ;;  %v397_v31 = vunpack.c.h.b16 %v381_v26 }
  0xb9   : > { %v2412_v29 = vpack.c.b16 %v389_v28, %v388_v27  ;;  %v2420_v32 = vpack.c.b16 %v397_v31, %v396_v30 }
  0xbb   : > { %478 = vrot.lane.b32.xlu1 %v2380_v19, %s2313_s7  ;;  %426 = vrot.lane.b32.xlu2 %v2380_v19, %s2314_s8 }
  0xbc   : > { %428 = vrot.lane.b32.xlu0 %v2382_v20, %s2314_s8 }
  0xc3   : > { %551 = vrot.lane.b32.xlu1 %v2380_v19, %s2315_s9  ;;  %480 = vrot.lane.b32.xlu2 %v2382_v20, %s2313_s7 }
  0xc4   : > { %439 = vrot.lane.b32.xlu0 %v2380_v19, %s2309_s28 }
  0xcb   : > { %924 = vrot.lane.b32.xlu1 %v2380_v19, %s2316_s10  ;;  %465 = vrot.lane.b32.xlu2 %v2380_v19, %s2317_s11 }
  0xcc   : > { %467 = vrot.lane.b32.xlu0 %v2382_v20, %s2317_s11 }
  0xd3   : > { %553 = vrot.lane.b32.xlu2 %v2382_v20, %s2315_s9  ;;  %404 = vrot.lane.b32.xlu1 %v2412_v29, %s2311_s30 }
  0xd4   : > { %454 = vrot.lane.b32.xlu0 %v2382_v20, %s2312_s6 }
  0xdb   : > { %926 = vrot.lane.b32.xlu2 %v2382_v20, %s2316_s10  ;;  %406 = vrot.lane.b32.xlu1 %v2420_v32, %s2311_s30 }
  0xdc   : > { %417 = vrot.lane.b32.xlu0 %v2412_v29, %s2310_s29 }
  0xe3   : > { %432 = vrot.lane.b32.xlu2 %v2420_v32, %s2314_s8  ;;  %419 = vrot.lane.b32.xlu1 %v2420_v32, %s2310_s29 }
  0xe4   : > { %445 = vrot.lane.b32.xlu0 %v2420_v32, %s2309_s28 }
  0xeb   : > { %443 = vrot.lane.b32.xlu2 %v2412_v29, %s2309_s28  ;;  %430 = vrot.lane.b32.xlu1 %v2412_v29, %s2314_s8 }
  0xec   : > { %484 = vrot.lane.b32.xlu0 %v2420_v32, %s2313_s7 }
  0xf3   : > { %482 = vrot.lane.b32.xlu2 %v2412_v29, %s2313_s7  ;;  %471 = vrot.lane.b32.xlu1 %v2420_v32, %s2317_s11 }
  0xf4   : > { %469 = vrot.lane.b32.xlu0 %v2412_v29, %s2317_s11 }
  0xfb   : > { %458 = vrot.lane.b32.xlu2 %v2420_v32, %s2312_s6  ;;  %456 = vrot.lane.b32.xlu1 %v2412_v29, %s2312_s6 }
  0xfc   : > { %555 = vrot.lane.b32.xlu0 %v2412_v29, %s2315_s9 }
 0x103   : > { %557 = vrot.lane.b32.xlu1 %v2420_v32, %s2315_s9 }
 0x104   : > { %928 = vrot.lane.b32.xlu0 %v2412_v29, %s2316_s10 }
 0x105   : > { %v414_v33 = vpop.permute.xlu2 %413 }
 0x10b   : > { %930 = vrot.lane.b32.xlu1 %v2420_v32, %s2316_s10 }
 0x10d   : > { %v2456_v34 = vpop.permute.xlu2 %415 }
 0x10e   : > { %v2550_v62 = vsel %vm421_vm7, %v414_v33, %v2456_v34 }
 0x115   : > { %v427_v35 = vpop.permute.xlu2 %426 }
 0x11d   : > { %v2458_v36 = vpop.permute.xlu1 %441  ;;  %v2460_v37 = vpop.permute.xlu2 %480 }
 0x11e   : > { %3650 = vst [vmem:[#allocation2_spill] sm:$0xff] %v2458_v36  ;;  %v401_v38 = vpop.permute.xlu0 %400  ;;  %609 = vrot.lane.b32.xlu1 %v2460_v37, %s2315_s9 }
 0x125   : > { %v453_v39 = vpop.permute.xlu1 %452  ;;  %v466_v45 = vpop.permute.xlu2 %465 }
 0x126   : > { %v2464_v40 = vpop.permute.xlu0 %402  ;;  %569 = vrot.lane.b32.xlu1 %v2456_v34, %s2315_s9 }
 0x127   : > { %v2562_v3 = vsel %vm408_vm8, %v401_v38, %v2464_v40 }
 0x12d   : > { %v479_v41 = vpop.permute.xlu1 %478  ;;  %v2486_v48 = vpop.permute.xlu2 %553 }
 0x12e   : > { %v2468_v42 = vpop.permute.xlu0 %428  ;;  %982 = vrot.lane.b32.xlu1 %v2460_v37, %s2316_s10  ;;  %v2532_v58 = vsel %vm486_vm5, %v479_v41, %v2460_v37 }
 0x12f   : > { %577 = vrot.lane.b32.xlu2 %v2468_v42, %s2315_s9  ;;  %v2492_v50 = vsel %vm434_vm2, %v427_v35, %v2468_v42 }
 0x135   : > { %v2474_v43 = vpop.permute.xlu1 %551  ;;  %v2502_v52 = vpop.permute.xlu2 %926 }
 0x136   : > { %v440_v44 = vpop.permute.xlu0 %439  ;;  %942 = vrot.lane.b32.xlu1 %v2456_v34, %s2316_s10  ;;  %3652 = vst [vmem:[#allocation4_spill] sm:$0xff] %v2502_v52 }
 0x137   : > { %v2518_v55 = vsel %vm447_vm4, %v440_v44, %v2458_v36 }
 0x13d   : > { %v2478_v46 = vpop.permute.xlu1 %924  ;;  %v2524_v57 = vpop.permute.xlu2 %432 }
 0x13e   : > { %3651 = vst [vmem:[#allocation3_spill] sm:$0xff] %v2478_v46  ;;  %v2480_v47 = vpop.permute.xlu0 %467  ;;  %958 = vrot.lane.b32.xlu1 %v2458_v36, %s2316_s10 }
 0x13f   : > { %601 = vrot.lane.b32.xlu0 %v2480_v47, %s2315_s9  ;;  %v2546_v61 = vsel %vm473_vm6, %v466_v45, %v2480_v47 }
 0x145   : > { %v2488_v49 = vpop.permute.xlu1 %404  ;;  %v2542_v60 = vpop.permute.xlu2 %443 }
 0x146   : > { %v2494_v51 = vpop.permute.xlu0 %454  ;;  %575 = vrot.lane.b32.xlu1 %v2492_v50, %s2315_s9 }
 0x147   : > { %593 = vrot.lane.b32.xlu2 %v2494_v51, %s2315_s9  ;;  %561 = vrot.lane.b32.xlu0 %v2464_v40, %s2315_s9  ;;  %v2508_v54 = vsel %vm460_vm3, %v453_v39, %v2494_v51 }
 0x14d   : > { %v2504_v53 = vpop.permute.xlu1 %406  ;;  %v483_v1 = vpop.permute.xlu2 %482 }
 0x14e   : > { %591 = vrot.lane.b32.xlu1 %v2508_v54, %s2315_s9  ;;  %v418_v2 = vpop.permute.xlu0 %417  ;;  %v2612_v13 = vsel %vm408_vm8, %v2488_v49, %v2504_v53 }
 0x14f   : > { %585 = vrot.lane.b32.xlu2 %v2458_v36, %s2315_s9  ;;  %974 = vrot.lane.b32.xlu0 %v2480_v47, %s2316_s10 }
 0x155   : > { %v2520_v56 = vpop.permute.xlu1 %419  ;;  %v2572_v5 = vpop.permute.xlu2 %458 }
 0x156   : > { %583 = vrot.lane.b32.xlu1 %v2518_v55, %s2315_s9  ;;  %v2580_v6 = vpop.permute.xlu0 %445  ;;  %v2663_v30 = vsel %vm421_vm7, %v418_v2, %v2520_v56 }
 0x157   : > { %950 = vrot.lane.b32.xlu2 %v2468_v42, %s2316_s10  ;;  %934 = vrot.lane.b32.xlu0 %v2464_v40, %s2316_s10  ;;  %v2715_v2 = vsel %vm447_vm4, %v2542_v60, %v2580_v6 }
 0x15d   : > { %v2540_v59 = vpop.permute.xlu1 %430 }
 0x15e   : > { %948 = vrot.lane.b32.xlu1 %v2492_v50, %s2316_s10  ;;  %v485_v8 = vpop.permute.xlu0 %484  ;;  %v2657_v28 = vsel %vm434_vm2, %v2540_v59, %v2524_v57 }
 0x15f   : > { %966 = vrot.lane.b32.xlu2 %v2494_v51, %s2316_s10  ;;  %607 = vrot.lane.b32.xlu0 %v2532_v58, %s2315_s9  ;;  %v2644_v24 = vsel %vm486_vm5, %v483_v1, %v485_v8 }
 0x165   : > { %v2558_v63 = vpop.permute.xlu1 %471 }
 0x166   : > { %964 = vrot.lane.b32.xlu1 %v2508_v54, %s2316_s10  ;;  %v470_v10 = vpop.permute.xlu0 %469 }
 0x167   : > { %599 = vrot.lane.b32.xlu2 %v2546_v61, %s2315_s9  ;;  %567 = vrot.lane.b32.xlu0 %v2550_v62, %s2315_s9  ;;  %v2599_v11 = vsel %vm473_vm6, %v470_v10, %v2558_v63 }
 0x16d   : > { %v2570_v4 = vpop.permute.xlu1 %456 }
 0x16e   : > { %581 = vrot.lane.b32.xlu1 %v2524_v57, %s2315_s9  ;;  %v2626_v16 = vpop.permute.xlu0 %555 }
 0x16f   : > { %559 = vrot.lane.b32.xlu2 %v2562_v3, %s2315_s9  ;;  %980 = vrot.lane.b32.xlu0 %v2532_v58, %s2316_s10 }
 0x175   : > { %v2582_v7 = vpop.permute.xlu1 %557 }
 0x176   : > { %597 = vrot.lane.b32.xlu1 %v2572_v5, %s2315_s9  ;;  %v2637_v22 = vpop.permute.xlu0 %928 }
 0x177   : > { %972 = vrot.lane.b32.xlu2 %v2546_v61, %s2316_s10  ;;  %940 = vrot.lane.b32.xlu0 %v2550_v62, %s2316_s10  ;;  %3654 = vst [vmem:[#allocation6_spill] sm:$0xff] %v2637_v22 }
 0x17d   : > { %v2595_v9 = vpop.permute.xlu1 %930 }
 0x17e   : > { %954 = vrot.lane.b32.xlu1 %v2524_v57, %s2316_s10  ;;  %3653 = vst [vmem:[#allocation5_spill] sm:$0xff] %v2595_v9 }
 0x17f   : > { %932 = vrot.lane.b32.xlu2 %v2562_v3, %s2316_s10  ;;  %956 = vrot.lane.b32.xlu0 %v2518_v55, %s2316_s10 }
 0x186   : > { %970 = vrot.lane.b32.xlu1 %v2572_v5, %s2316_s10 }
 0x187   : > { %613 = vrot.lane.b32.xlu0 %v485_v8, %s2315_s9  ;;  %605 = vrot.lane.b32.xlu2 %v2558_v63, %s2315_s9 }
 0x189   : > { %v2622_v15 = vpop.permute.xlu2 %577 }
 0x18e   : > { %603 = vrot.lane.b32.xlu1 %v2599_v11, %s2315_s9 }
 0x18f   : > { %573 = vrot.lane.b32.xlu0 %v2520_v56, %s2315_s9  ;;  %565 = vrot.lane.b32.xlu2 %v2504_v53, %s2315_s9 }
 0x190   : > { %v2607_v12 = vpop.permute.xlu1 %609 }
 0x196   : > { %563 = vrot.lane.b32.xlu1 %v2612_v13, %s2315_s9 }
 0x197   : > { %589 = vrot.lane.b32.xlu0 %v2580_v6, %s2315_s9  ;;  %978 = vrot.lane.b32.xlu2 %v2558_v63, %s2316_s10 }
 0x198   : > { %v2620_v14 = vpop.permute.xlu1 %569 }
 0x19e   : > { %1197 = vrot.lane.b32.xlu1 %v2468_v42, %s2318_s12 }
 0x19f   : > { %986 = vrot.lane.b32.xlu0 %v485_v8, %s2316_s10  ;;  %938 = vrot.lane.b32.xlu2 %v2504_v53, %s2316_s10 }
 0x1a0   : > { %v983_v17 = vpop.permute.xlu1 %982 }
 0x1a1   : > { %v2631_v18 = vpop.permute.xlu2 %593 }
 0x1a6   : > { %1480 = vrot.lane.b32.xlu1 %v485_v8, %s2319_s13 }
 0x1a7   : > { %946 = vrot.lane.b32.xlu0 %v2520_v56, %s2316_s10  ;;  %1233 = vrot.lane.b32.xlu2 %v485_v8, %s2318_s12 }
 0x1a8   : > { %v943_v21 = vpop.permute.xlu1 %942 }
 0x1a9   : > { %v2639_v23 = vpop.permute.xlu2 %585 }
 0x1ae   : > { %1444 = vrot.lane.b32.xlu1 %v2468_v42, %s2319_s13  ;;  %v2688_v42 = vsel %vm460_vm3, %v2570_v4, %v2572_v5 }
 0x1af   : > { %962 = vrot.lane.b32.xlu0 %v2580_v6, %s2316_s10  ;;  %611 = vrot.lane.b32.xlu2 %v2644_v24, %s2315_s9 }
 0x1b0   : > { %v959_v25 = vpop.permute.xlu1 %958 }
 0x1b1   : > { %v2650_v26 = vpop.permute.xlu2 %950  ;;  %v2652_v27 = vpop.permute.xlu0 %601 }
 0x1b2   : > { %3655 = vst [vmem:[#allocation7_spill] sm:$0xff] %v2650_v26 }
 0x1b6   : > { %976 = vrot.lane.b32.xlu1 %v2599_v11, %s2316_s10 }
 0x1b7   : > { %579 = vrot.lane.b32.xlu0 %v2657_v28, %s2315_s9  ;;  %571 = vrot.lane.b32.xlu2 %v2663_v30, %s2315_s9 }
 0x1b8   : > { %v2669_v31 = vpop.permute.xlu1 %575 }
 0x1b9   : > { %v967_v33 = vpop.permute.xlu2 %966  ;;  %v2671_v35 = vpop.permute.xlu0 %561 }
 0x1be   : > { %936 = vrot.lane.b32.xlu1 %v2612_v13, %s2316_s10 }
 0x1bf   : > { %1201 = vrot.lane.b32.xlu0 %v2524_v57, %s2318_s12  ;;  %1227 = vrot.lane.b32.xlu2 %v2532_v58, %s2318_s12 }
 0x1c0   : > { %v2679_v38 = vpop.permute.xlu1 %591 }
 0x1c1   : > { %v2681_v39 = vpop.permute.xlu2 %599  ;;  %v2683_v41 = vpop.permute.xlu0 %974 }
 0x1c6   : > { %1231 = vrot.lane.b32.xlu1 %v2644_v24, %s2318_s12 }
 0x1c7   : > { %1448 = vrot.lane.b32.xlu2 %v2524_v57, %s2319_s13  ;;  %595 = vrot.lane.b32.xlu0 %v2688_v42, %s2315_s9 }
 0x1c8   : > { %v2696_v44 = vpop.permute.xlu1 %583 }
 0x1c9   : > { %v2698_v45 = vpop.permute.xlu2 %559  ;;  %v935_v49 = vpop.permute.xlu0 %934 }
 0x1ce   : > { %1446 = vrot.lane.b32.xlu1 %v2657_v28, %s2319_s13 }
 0x1cf   : > { %1225 = vrot.lane.b32.xlu2 %v2558_v63, %s2318_s12  ;;  %1195 = vrot.lane.b32.xlu0 %v2492_v50, %s2318_s12 }
 0x1d0   : > { %v2706_v59 = vpop.permute.xlu1 %948 }
 0x1d1   : > { %3656 = vst [vmem:[#allocation8_spill] sm:$0xff] %v2706_v59  ;;  %v2708_v57 = vpop.permute.xlu2 %972  ;;  %v608_v1 = vpop.permute.xlu0 %607 }
 0x1d6   : > { %1223 = vrot.lane.b32.xlu1 %v2599_v11, %s2318_s12 }
 0x1d7   : > { %587 = vrot.lane.b32.xlu2 %v2715_v2, %s2315_s9  ;;  %1229 = vrot.lane.b32.xlu0 %v2460_v37, %s2318_s12  ;;  %s2198_s9 = sshll.u32 %s3679_s19, 7 }
 0x1d8   : > { %v965_v4 = vpop.permute.xlu1 %964  ;;  %s3524_s14 = scalar_lea.vmem %s3646_s4, %s2198_s9 }
 0x1d9   : > { %v933_v8 = vpop.permute.xlu2 %932  ;;  %v2721_v10 = vpop.permute.xlu0 %567  ;;  %v2724_v46 = vsel %vm988_vm9, %v965_v4, %v967_v33 }
 0x1da   : > { %3657 = vst [vmem:[#allocation9_spill] sm:$0xff] %v2724_v46  ;;  %v2727_v52 = vsel %vm988_vm9, %v933_v8, %v935_v49 }
 0x1db   : > { %3658 = vst [vmem:[#allocation10_spill] sm:$0xff] %v2727_v52 }
 0x1de   : > { %1187 = vrot.lane.b32.xlu1 %v2550_v62, %s2318_s12 }
 0x1df   : > { %1474 = vrot.lane.b32.xlu2 %v2532_v58, %s2319_s13  ;;  %1193 = vrot.lane.b32.xlu0 %v2520_v56, %s2318_s12 }
 0x1e0   : > { %v2735_v60 = vpop.permute.xlu1 %581 }
 0x1e1   : > { %v981_v22 = vpop.permute.xlu0 %980  ;;  %v606_v9 = vpop.permute.xlu2 %605 }
 0x1e2   : > { %v2738_v59 = vsel %vm988_vm9, %v981_v22, %v983_v17 }
 0x1e6   : > { %1221 = vrot.lane.b32.xlu1 %v2480_v47, %s2318_s12 }
 0x1e7   : > { %984 = vrot.lane.b32.xlu2 %v2644_v24, %s2316_s10  ;;  %1442 = vrot.lane.b32.xlu0 %v2492_v50, %s2319_s13 }
 0x1e8   : > { %v2746_v33 = vpop.permute.xlu1 %597 }
 0x1e9   : > { %v941_v49 = vpop.permute.xlu0 %940  ;;  %v2748_v4 = vpop.permute.xlu2 %565 }
 0x1ea   : > { %v2751_v8 = vsel %vm988_vm9, %v941_v49, %v943_v21 }
 0x1eb   : > { %3659 = vst [vmem:[#allocation11_spill] sm:$0xff] %v2751_v8 }
 0x1ee   : > { %1470 = vrot.lane.b32.xlu1 %v2599_v11, %s2319_s13 }
 0x1ef   : > { %944 = vrot.lane.b32.xlu2 %v2663_v30, %s2316_s10  ;;  %952 = vrot.lane.b32.xlu0 %v2657_v28, %s2316_s10 }
 0x1f0   : > { %v2759_v17 = vpop.permute.xlu1 %954 }
 0x1f1   : > { %v957_v22 = vpop.permute.xlu0 %956  ;;  %v2761_v52 = vpop.permute.xlu2 %978 }
 0x1f2   : > { %v2764_v46 = vsel %vm988_vm9, %v957_v22, %v959_v25 }
 0x1f3   : > { %3660 = vst [vmem:[#allocation12_spill] sm:$0xff] %v2764_v46 }
 0x1f6   : > { %1185 = vrot.lane.b32.xlu1 %v2504_v53, %s2318_s12 }
 0x1f7   : > { %960 = vrot.lane.b32.xlu2 %v2715_v2, %s2316_s10  ;;  %968 = vrot.lane.b32.xlu0 %v2688_v42, %s2316_s10 }
 0x1f8   : > { %v2772_v21 = vpop.permute.xlu1 %970 }
 0x1f9   : > { %3661 = vst [vmem:[#allocation13_spill] sm:$0xff] %v2772_v21  ;;  %v614_v49 = vpop.permute.xlu0 %613  ;;  %v2774_v8 = vpop.permute.xlu2 %938 }
 0x1fa   : > { %3662 = vst [vmem:[#allocation14_spill] sm:$0xff] %v2774_v8 }
 0x1fe   : > { %1434 = vrot.lane.b32.xlu1 %v2550_v62, %s2319_s13 }
 0x1ff   : > { %1199 = vrot.lane.b32.xlu2 %v2657_v28, %s2318_s12  ;;  %1478 = vrot.lane.b32.xlu0 %v2644_v24, %s2319_s13 }
 0x200   : > { %v604_v25 = vpop.permute.xlu1 %603 }
 0x201   : > { %v574_v22 = vpop.permute.xlu0 %573  ;;  %v2782_v46 = vpop.permute.xlu2 %1233 }
 0x202   : > { %3663 = vst [vmem:[#allocation15_spill] sm:$0xff] %v2782_v46 }
 0x206   : > { %1468 = vrot.lane.b32.xlu1 %v2480_v47, %s2319_s13 }
 0x207   : > { %1191 = vrot.lane.b32.xlu2 %v2663_v30, %s2318_s12  ;;  %1476 = vrot.lane.b32.xlu0 %v2460_v37, %s2319_s13  ;;  %v630_v37 = vsel %vm615_vm10, %v608_v1, %v2607_v12  ;;  %v628_v12 = vsel %vm615_vm10, %v2681_v39, %v2652_v27 }
 0x208   : > { %v2790_v8 = vpop.permute.xlu1 %563 }
 0x209   : > { %v2792_v21 = vpop.permute.xlu0 %589  ;;  %v612_v26 = vpop.permute.xlu2 %611 }
 0x20a   : > { %v631_v36 = vsel %vm615_vm10, %v612_v26, %v614_v49 }
 0x20b   : > { %687 = vmatpush.bf16.msrb.mxu0 %v631_v36  ;;  %2272 = vmatpush.bf16.msra.mxu3 %v631_v36  ;;  %v629_v36 = vsel %vm615_vm10, %v604_v25, %v606_v9 }
 0x20e   : > { %1211 = vrot.lane.b32.xlu1 %v2508_v54, %s2318_s12 }
 0x20f   : > { %1189 = vrot.lane.b32.xlu2 %v2456_v34, %s2318_s12  ;;  %1219 = vrot.lane.b32.xlu0 %v2546_v61, %s2318_s12 }
 0x210   : > { %688 = vmatpush.bf16.msrb.mxu0 %v630_v37  ;;  %2273 = vmatpush.bf16.msra.mxu3 %v630_v37  ;;  %v2803_v47 = vpop.permute.xlu1 %1197 }
 0x211   : > { %v2805_v46 = vpop.permute.xlu0 %986  ;;  %v572_v26 = vpop.permute.xlu2 %571 }
 0x214   : > { %689 = vmatpush.bf16.msrb.mxu0 %v629_v36  ;;  %2274 = vmatpush.bf16.msra.mxu3 %v629_v36  ;;  %v622_v36 = vsel %vm615_vm10, %v2669_v31, %v2622_v15 }
 0x216   : > { %1432 = vrot.lane.b32.xlu1 %v2504_v53, %s2319_s13 }
 0x217   : > { %1438 = vrot.lane.b32.xlu2 %v2663_v30, %s2319_s13  ;;  %1440 = vrot.lane.b32.xlu0 %v2520_v56, %s2319_s13 }
 0x218   : > { %690 = vmatpush.bf16.msrb.mxu0 %v628_v12  ;;  %2275 = vmatpush.bf16.msra.mxu3 %v628_v12  ;;  %v2817_v1 = vpop.permute.xlu1 %1480 }
 0x219   : > { %v2819_v9 = vpop.permute.xlu0 %946  ;;  %v2821_v49 = vpop.permute.xlu2 %1227 }
 0x21e   : > { %1175 = vrot.lane.b32.xlu1 %v2412_v29, %s2318_s12 }
 0x21f   : > { %1472 = vrot.lane.b32.xlu2 %v2558_v63, %s2319_s13  ;;  %1183 = vrot.lane.b32.xlu0 %v2612_v13, %s2318_s12 }
 0x220   : > { %v2829_v53 = vpop.permute.xlu1 %1444 }
 0x221   : > { %v2831_v56 = vpop.permute.xlu0 %962  ;;  %v2833_v27 = vpop.permute.xlu2 %1448 }
 0x226   : > { %1209 = vrot.lane.b32.xlu1 %v2580_v6, %s2318_s12 }
 0x227   : > { %1215 = vrot.lane.b32.xlu2 %v2688_v42, %s2318_s12  ;;  %1217 = vrot.lane.b32.xlu0 %v2572_v5, %s2318_s12 }
 0x228   : > { %v2841_v39 = vpop.permute.xlu1 %976 }
 0x229   : > { %v580_v63 = vpop.permute.xlu0 %579  ;;  %v2843_v25 = vpop.permute.xlu2 %1225 }
 0x22a   : > { %v623_v37 = vsel %vm615_vm10, %v580_v63, %v2735_v60 }
 0x22b   : > { %648 = vmatpush.bf16.msrb.mxu1 %v623_v37  ;;  %2264 = vmatpush.bf16.msra.mxu2 %v623_v37  ;;  %v621_v37 = vsel %vm615_vm10, %v572_v26, %v574_v22 }
 0x22e   : > { %1458 = vrot.lane.b32.xlu1 %v2508_v54, %s2319_s13 }
 0x22f   : > { %1436 = vrot.lane.b32.xlu2 %v2456_v34, %s2319_s13  ;;  %1466 = vrot.lane.b32.xlu0 %v2546_v61, %s2319_s13  ;;  %v620_v34 = vsel %vm615_vm10, %v2721_v10, %v2620_v14  ;;  %v618_v14 = vsel %vm615_vm10, %v2698_v45, %v2671_v35  ;;  %v626_v10 = vsel %vm615_vm10, %v2679_v38, %v2631_v18  ;;  %v1963_v18 = vld [vmem:[%s3644_s2 + $0xa8] sm:$0xf]  ;;  %v2228_v38 = vld [vmem:[%s3644_s2 + $0xcc] sm:$0xf0] }
 0x230   : > { %649 = vmatpush.bf16.msrb.mxu1 %v622_v36  ;;  %2265 = vmatpush.bf16.msra.mxu2 %v622_v36  ;;  %v2856_v12 = vpop.permute.xlu1 %936  ;;  %v619_v36 = vsel %vm615_vm10, %v2790_v8, %v2748_v4  ;;  %v2223_v45 = vld [vmem:[%s3644_s2 + $0xac] sm:$0xf] }
 0x231   : > { %v2858_v60 = vpop.permute.xlu0 %1201  ;;  %v588_v63 = vpop.permute.xlu2 %587 }
 0x232   : > { %v625_v35 = vsel %vm615_vm10, %v588_v63, %v2792_v21  ;;  %v2208_v21 = vld [vmem:[%s3644_s2 + $0x2c] sm:$0xf0]  ;;  %v2203_v63 = vld [vmem:[%s3644_s2 + $0xc] sm:$0xf] }
 0x234   : > { %650 = vmatpush.bf16.msrb.mxu1 %v621_v37  ;;  %2266 = vmatpush.bf16.msra.mxu2 %v621_v37  ;;  %v617_v37 = vsel %vm615_vm10, %v2626_v16, %v2582_v7  ;;  %v1965_v7 = vld [vmem:[%s3644_s2 + $0xd0] sm:$0xf0]  ;;  %v1947_v16 = vld [vmem:[%s3644_s2 + $0x8] sm:$0xf] }
 0x236   : > { %1173 = vrot.lane.b32.xlu1 %v2382_v20, %s2318_s12 }
 0x237   : > { %1179 = vrot.lane.b32.xlu2 %v2562_v3, %s2318_s12  ;;  %1181 = vrot.lane.b32.xlu0 %v2464_v40, %s2318_s12 }
 0x238   : > { %651 = vmatpush.bf16.msrb.mxu1 %v620_v34  ;;  %2267 = vmatpush.bf16.msra.mxu2 %v620_v34  ;;  %v2870_v15 = vpop.permute.xlu1 %1231  ;;  %v1949_v34 = vld [vmem:[%s3644_s2 + $0x30] sm:$0xf0] }
 0x239   : > { %v2872_v31 = vpop.permute.xlu2 %1474  ;;  %v596_v22 = vpop.permute.xlu0 %595 }
 0x23a   : > { %v627_v26 = vsel %vm615_vm10, %v596_v22, %v2746_v33  ;;  %v616_v22 = vsel %vm615_vm10, %v2474_v43, %v2486_v48 }
 0x23b   : > { %691 = vmatpush.bf16.msrb.mxu0 %v627_v26  ;;  %2276 = vmatpush.bf16.msra.mxu3 %v627_v26  ;;  %v1964_v26 = vor.u32 %v2228_v38, %v1963_v18 }
 0x23c   : > { %652 = vmatpush.bf16.msrb.mxu1 %v619_v36  ;;  %2268 = vmatpush.bf16.msra.mxu2 %v619_v36  ;;  %v1968_v36 = vor.u32 %v2223_v45, %v1965_v7  ;;  %v1981_v7 = vld [vmem:[%s3644_s2 + $0x170] sm:$0xf0] }
 0x23e   : > { %1422 = vrot.lane.b32.xlu1 %v2412_v29, %s2319_s13 }
 0x23f   : > { %1213 = vrot.lane.b32.xlu2 %v2494_v51, %s2318_s12  ;;  %1430 = vrot.lane.b32.xlu0 %v2612_v13, %s2319_s13 }
 0x240   : > { %653 = vmatpush.bf16.msrb.mxu1 %v618_v14  ;;  %2269 = vmatpush.bf16.msra.mxu2 %v618_v14  ;;  %v2893_v8 = vpop.permute.xlu1 %1446  ;;  %v1948_v14 = vor.u32 %v2208_v21, %v1947_v16  ;;  %v1995_v16 = vld [vmem:[%s3644_s2] sm:$0xf]  ;;  %v1997_v21 = vld [vmem:[%s3644_s2 + $0x28] sm:$0xf0] }
 0x241   : > { %692 = vmatpush.bf16.msrb.mxu0 %v626_v10  ;;  %2277 = vmatpush.bf16.msra.mxu3 %v626_v10  ;;  %v985_v33 = vpop.permute.xlu2 %984  ;;  %v2891_v4 = vpop.permute.xlu0 %1195 }
 0x242   : > { %v1004_v43 = vsel %vm988_vm9, %v985_v33, %v2805_v46  ;;  %v1957_v33 = vld [vmem:[%s3644_s2 + $0x80] sm:$0xf0] }
 0x244   : > { %654 = vmatpush.bf16.msrb.mxu1 %v617_v37  ;;  %2270 = vmatpush.bf16.msra.mxu2 %v617_v37 }
 0x245   : > { %693 = vmatpush.bf16.msrb.mxu0 %v625_v35  ;;  %2278 = vmatpush.bf16.msra.mxu3 %v625_v35 }
 0x246   : > { %1456 = vrot.lane.b32.xlu1 %v2580_v6, %s2319_s13  ;;  %v624_v6 = vsel %vm615_vm10, %v2696_v44, %v2639_v23 }
 0x247   : > { %1462 = vrot.lane.b32.xlu2 %v2688_v42, %s2319_s13  ;;  %1464 = vrot.lane.b32.xlu0 %v2572_v5, %s2319_s13  ;;  %v1952_v5 = vor.u32 %v2203_v63, %v1949_v34  ;;  %v3665_v63 = vld [vmem:[#allocation2_spill] sm:$0xff]  ;;  %v3666_v34 = vld [vmem:[#allocation7_spill] sm:$0xff] }
 0x248   : > { %655 = vmatpush.bf16.msrb.mxu1 %v616_v22  ;;  %2271 = vmatpush.bf16.msra.mxu2 %v616_v22  ;;  %v2944_v48 = vpop.permute.xlu1 %1223  ;;  %v3667_v22 = vld [vmem:[#allocation8_spill] sm:$0xff] }
 0x249   : > { %694 = vmatpush.bf16.msrb.mxu0 %v624_v6  ;;  %2279 = vmatpush.bf16.msra.mxu3 %v624_v6  ;;  %v2936_v10 = vpop.permute.xlu2 %944  ;;  %v2938_v37 = vpop.permute.xlu0 %1229 }
 0x24b   : > { %666 = vmatmul.bf16.vlgmr.msra.gmra.mxu2 %v1964_v26  ;;  %656 = vmatmul.bf16.vlgmr.msrb.gmra.mxu1 %v1948_v14  ;;  %v995_v26 = vsel %vm988_vm9, %v3667_v22, %v3666_v34 }
 0x24c   : > { %825 = vmatpush.bf16.msra.mxu1 %v2644_v24  ;;  %705 = vmatmul.bf16.vlgmr.msra.gmra.mxu3 %v1968_v36  ;;  %v2238_v24 = vld [vmem:[%s3644_s2 + $0x11c] sm:$0xf0] }
 0x24d   : > { %786 = vmatpush.bf16.msra.mxu0 %v2657_v28  ;;  %1060 = vmatpush.bf16.msrb.mxu3 %v1004_v43  ;;  %v2233_v28 = vld [vmem:[%s3644_s2 + $0xfc] sm:$0xf] }
 0x24e   : > { %695 = vmatmul.bf16.vlgmr.msrb.gmra.mxu0 %v1952_v5  ;;  %1450 = vrot.lane.b32.xlu1 %v2518_v55, %s2319_s13  ;;  %v1242_v5 = vsel %vm1235_vm11, %v2891_v4, %v2803_v47  ;;  %v3670_v4 = vld [vmem:[#allocation9_spill] sm:$0xff] }
 0x24f   : > { %1177 = vrot.lane.b32.xlu2 %v2420_v32, %s2318_s12  ;;  %1207 = vrot.lane.b32.xlu0 %v2715_v2, %s2318_s12 }
 0x250   : > { %826 = vmatpush.bf16.msra.mxu1 %v2532_v58  ;;  %v1971_v58 = vld [vmem:[%s3644_s2 + $0xf8] sm:$0xf]  ;;  %v2982_v44 = vpop.permute.xlu1 %1187 }
 0x251   : > { %787 = vmatpush.bf16.msra.mxu0 %v2492_v50  ;;  %1061 = vmatpush.bf16.msrb.mxu3 %v2738_v59  ;;  %v2955_v46 = vpop.permute.xlu2 %960  ;;  %v2957_v23 = vpop.permute.xlu0 %1193  ;;  %v1002_v50 = vsel %vm988_vm9, %v2841_v39, %v2761_v52  ;;  %v1955_v52 = vld [vmem:[%s3644_s2 + $0x58] sm:$0xf]  ;;  %v1001_v59 = vsel %vm988_vm9, %v2708_v57, %v2683_v41  ;;  %v2213_v39 = vld [vmem:[%s3644_s2 + $0x5c] sm:$0xf]  ;;  %v1972_v35 = vor.u32 %v2238_v24, %v1971_v58  ;;  %v3668_v58 = vld [vmem:[#allocation13_spill] sm:$0xff] }
 0x252   : > { %v1960_v18 = vor.u32 %v2213_v39, %v1957_v33  ;;  %v2212_v33 = vld [vmem:[%s3644_s2 + $0x54] sm:$0xf] }
 0x254   : > { %827 = vmatpush.bf16.msra.mxu1 %v2599_v11  ;;  %v1973_v11 = vld [vmem:[%s3644_s2 + $0x120] sm:$0xf0] }
 0x255   : > { %788 = vmatpush.bf16.msra.mxu0 %v2663_v30  ;;  %1062 = vmatpush.bf16.msrb.mxu3 %v1002_v50  ;;  %v2218_v30 = vld [vmem:[%s3644_s2 + $0x7c] sm:$0xf0] }
 0x256   : > { %1612 = vrot.lane.b32.xlu1 %v2365_v0, %s2310_s29 }
 0x257   : > { %1426 = vrot.lane.b32.xlu2 %v2562_v3, %s2319_s13  ;;  %1428 = vrot.lane.b32.xlu0 %v2464_v40, %s2319_s13 }
 0x258   : > { %828 = vmatpush.bf16.msra.mxu1 %v2546_v61  ;;  %v1976_v61 = vor.u32 %v2233_v28, %v1973_v11  ;;  %v3007_v38 = vpop.permute.xlu1 %1221 }
 0x259   : > { %789 = vmatpush.bf16.msra.mxu0 %v2550_v62  ;;  %1063 = vmatpush.bf16.msrb.mxu3 %v1001_v59  ;;  %v1956_v62 = vor.u32 %v2218_v30, %v1955_v52  ;;  %v1200_v41 = vpop.permute.xlu2 %1199  ;;  %v3001_v57 = vpop.permute.xlu0 %1442  ;;  %v994_v52 = vsel %vm988_vm9, %v2936_v10, %v2819_v9  ;;  %v3669_v9 = vld [vmem:[#allocation11_spill] sm:$0xff]  ;;  %v1987_v30 = vld [vmem:[%s3644_s2 + $0x198] sm:$0xf]  ;;  %v2253_v59 = vld [vmem:[%s3644_s2 + $0x19c] sm:$0xf] }
 0x25b   : > { %671 = vmatmul.bf16.gmra.mxu2 %v1972_v35  ;;  %661 = vmatmul.bf16.gmra.mxu1 %v1956_v62  ;;  %v2005_v35 = vld [vmem:[%s3644_s2 + $0x78] sm:$0xf0]  ;;  %v3672_v62 = vld [vmem:[#allocation10_spill] sm:$0xff] }
 0x25c   : > { %829 = vmatpush.bf16.msra.mxu1 %v2688_v42  ;;  %710 = vmatmul.bf16.gmra.mxu3 %v1976_v61 }
 0x25d   : > { %790 = vmatpush.bf16.msra.mxu0 %v2612_v13 }
 0x25e   : > { %700 = vmatmul.bf16.gmra.mxu0 %v1960_v18 }
 0x25f   : > { %1460 = vrot.lane.b32.xlu2 %v2494_v51, %s2319_s13  ;;  %1171 = vrot.lane.b32.xlu0 %v2380_v19, %s2318_s12  ;;  %v2248_v51 = vld [vmem:[%s3644_s2 + $0x16c] sm:$0xf0] }
 0x260   : > { %830 = vmatpush.bf16.msra.mxu1 %v2508_v54  ;;  %v1979_v54 = vld [vmem:[%s3644_s2 + $0x148] sm:$0xf]  ;;  %v3058_v50 = vpop.permute.xlu1 %1470 }
 0x261   : > { %791 = vmatpush.bf16.msra.mxu0 %v2562_v3  ;;  %v1192_v40 = vpop.permute.xlu2 %1191  ;;  %v953_v13 = vpop.permute.xlu0 %952  ;;  %v3664_v3 = vld [vmem:[#allocation15_spill] sm:$0xff]  ;;  %v1980_v6 = vor.u32 %v2248_v51, %v1979_v54  ;;  %v3674_v54 = vld [vmem:[#allocation5_spill] sm:$0xff]  ;;  %v3675_v51 = vld [vmem:[#allocation6_spill] sm:$0xff] }
 0x262   : > { %v996_v42 = vsel %vm988_vm9, %v953_v13, %v2759_v17  ;;  %v1251_v45 = vsel %vm1235_vm11, %v2870_v15, %v3664_v3  ;;  %v2243_v17 = vld [vmem:[%s3644_s2 + $0x14c] sm:$0xf]  ;;  %v2202_v15 = vld [vmem:[%s3644_s2 + $0x4] sm:$0xf]  ;;  %v1241_v47 = vsel %vm1235_vm11, %v1192_v40, %v2957_v23  ;;  %v990_v3 = vsel %vm988_vm9, %v3675_v51, %v3674_v54 }
 0x263   : > { %1021 = vmatpush.bf16.msrb.mxu2 %v996_v42  ;;  %v1984_v43 = vor.u32 %v2243_v17, %v1981_v7  ;;  %v2000_v11 = vor.u32 %v2202_v15, %v1997_v21  ;;  %v3671_v23 = vld [vmem:[#allocation14_spill] sm:$0xff]  ;;  %v2008_v42 = vor.u32 %v2212_v33, %v2005_v35  ;;  %v1490_v17 = vsel %vm1482_vm12, %v2893_v8, %v2833_v27  ;;  %v2043_v27 = vld [vmem:[%s3644_s2 + $0x10] sm:$0xf]  ;;  %v2209_v8 = vld [vmem:[%s3644_s2 + $0x34] sm:$0xf0] }
 0x264   : > { %831 = vmatpush.bf16.msra.mxu1 %v2715_v2  ;;  %v1489_v21 = vsel %vm1482_vm12, %v3001_v57, %v2829_v53  ;;  %v2011_v53 = vld [vmem:[%s3644_s2 + $0xa0] sm:$0xf]  ;;  %v2227_v57 = vld [vmem:[%s3644_s2 + $0xc4] sm:$0xf0]  ;;  %v2044_v22 = vor.u32 %v2209_v8, %v2043_v27  ;;  %v2242_v51 = vld [vmem:[%s3644_s2 + $0x144] sm:$0xf] }
 0x265   : > { %792 = vmatpush.bf16.msra.mxu0 %v2412_v29  ;;  %v1243_v29 = vsel %vm1235_vm11, %v1200_v41, %v2858_v60  ;;  %v2207_v60 = vld [vmem:[%s3644_s2 + $0x24] sm:$0xf0]  ;;  %v3673_v41 = vld [vmem:[#allocation12_spill] sm:$0xff]  ;;  %v2234_v8 = vld [vmem:[%s3644_s2 + $0x104] sm:$0xf] }
 0x266   : > { %v1996_v28 = vor.u32 %v2207_v60, %v1995_v16  ;;  %v2239_v27 = vld [vmem:[%s3644_s2 + $0x124] sm:$0xf0] }
 0x267   : > { %1203 = vrot.lane.b32.xlu2 %v2518_v55, %s2318_s12  ;;  %1205 = vrot.lane.b32.xlu0 %v3665_v63, %s2318_s12 }
 0x268   : > { %832 = vmatpush.bf16.msra.mxu1 %v2518_v55  ;;  %1022 = vmatpush.bf16.msrb.mxu2 %v995_v26  ;;  %v1250_v55 = vsel %vm1235_vm11, %v2821_v49, %v2938_v37  ;;  %v1249_v49 = vsel %vm1235_vm11, %v2944_v48, %v2843_v25  ;;  %v3083_v48 = vpop.permute.xlu1 %1185  ;;  %v2222_v26 = vld [vmem:[%s3644_s2 + $0xa4] sm:$0xf] }
 0x269   : > { %793 = vmatpush.bf16.msra.mxu0 %v2380_v19  ;;  %v1190_v36 = vpop.permute.xlu2 %1189  ;;  %v969_v14 = vpop.permute.xlu0 %968 }
 0x26a   : > { %v1000_v24 = vsel %vm988_vm9, %v969_v14, %v3668_v58  ;;  %v1240_v25 = vsel %vm1235_vm11, %v2982_v44, %v1190_v36  ;;  %v2258_v44 = vld [vmem:[%s3644_s2 + $0x1bc] sm:$0xf0] }
 0x26b   : > { %1064 = vmatpush.bf16.msrb.mxu3 %v1000_v24  ;;  %676 = vmatmul.bf16.gmra.mxu2 %v1980_v6  ;;  %v1988_v39 = vor.u32 %v2258_v44, %v1987_v30  ;;  %v2013_v6 = vld [vmem:[%s3644_s2 + $0xc8] sm:$0xf0]  ;;  %v2021_v30 = vld [vmem:[%s3644_s2 + $0x118] sm:$0xf0] }
 0x26c   : > { %1307 = vmatpush.bf16.msrb.mxu1 %v1251_v45  ;;  %1023 = vmatpush.bf16.msrb.mxu2 %v994_v52  ;;  %v3676_v45 = vld [vmem:[#allocation4_spill] sm:$0xff] }
 0x26d   : > { %1268 = vmatpush.bf16.msrb.mxu0 %v1243_v29  ;;  %715 = vmatmul.bf16.gmra.mxu3 %v1984_v43 }
 0x26e   : > { %794 = vmatmul.bf16.vlgmr.msra.gmra.mxu0 %v1996_v28  ;;  %833 = vmatmul.bf16.vlgmr.msra.gmra.mxu1 %v2000_v11 }
 0x26f   : > { %1424 = vrot.lane.b32.xlu2 %v2420_v32, %s2319_s13  ;;  %1454 = vrot.lane.b32.xlu0 %v2715_v2, %s2319_s13  ;;  %v992_v32 = vsel %vm988_vm9, %v2856_v12, %v3671_v23  ;;  %v998_v2 = vsel %vm988_vm9, %v2955_v46, %v2831_v56  ;;  %v1989_v12 = vld [vmem:[%s3644_s2 + $0x1c0] sm:$0xf0]  ;;  %v2003_v56 = vld [vmem:[%s3644_s2 + $0x50] sm:$0xf] }
 0x270   : > { %1308 = vmatpush.bf16.msrb.mxu1 %v1250_v55  ;;  %1024 = vmatpush.bf16.msrb.mxu2 %v3669_v9  ;;  %v2217_v46 = vld [vmem:[%s3644_s2 + $0x74] sm:$0xf0]  ;;  %v1992_v40 = vor.u32 %v2253_v59, %v1989_v12  ;;  %v2016_v55 = vor.u32 %v2222_v26, %v2013_v6  ;;  %v2214_v9 = vld [vmem:[%s3644_s2 + $0x64] sm:$0xf]  ;;  %v2252_v26 = vld [vmem:[%s3644_s2 + $0x194] sm:$0xf] }
 0x271   : > { %1269 = vmatpush.bf16.msrb.mxu0 %v1242_v5  ;;  %1065 = vmatpush.bf16.msrb.mxu3 %v3670_v4  ;;  %v3079_v10 = vpop.permute.xlu2 %1438  ;;  %v1479_v37 = vpop.permute.xlu0 %1478  ;;  %v2053_v4 = vld [vmem:[%s3644_s2 + $0x88] sm:$0xf0]  ;;  %v2037_v6 = vld [vmem:[%s3644_s2 + $0x1b8] sm:$0xf0] }
 0x272   : > { %v1498_v61 = vsel %vm1482_vm12, %v1479_v37, %v2817_v1  ;;  %v1435_v1 = vpop.permute.xlu1 %1434  ;;  %v2237_v37 = vld [vmem:[%s3644_s2 + $0x114] sm:$0xf0] }
 0x274   : > { %1309 = vmatpush.bf16.msrb.mxu1 %v1249_v49  ;;  %1025 = vmatpush.bf16.msrb.mxu2 %v992_v32  ;;  %v2219_v49 = vld [vmem:[%s3644_s2 + $0x84] sm:$0xf0]  ;;  %v2056_v32 = vor.u32 %v2214_v9, %v2053_v4  ;;  %v2077_v9 = vld [vmem:[%s3644_s2 + $0x178] sm:$0xf0] }
 0x275   : > { %1270 = vmatpush.bf16.msrb.mxu0 %v1241_v47  ;;  %1066 = vmatpush.bf16.msrb.mxu3 %v998_v2  ;;  %v2051_v47 = vld [vmem:[%s3644_s2 + $0x60] sm:$0xf]  ;;  %v2232_v2 = vld [vmem:[%s3644_s2 + $0xf4] sm:$0xf] }
 0x277   : > { %1418 = vrot.lane.b32.xlu2 %v2380_v19, %s2319_s13  ;;  %1420 = vrot.lane.b32.xlu0 %v2382_v20, %s2319_s13  ;;  %v2004_v20 = vor.u32 %v2217_v46, %v2003_v56  ;;  %v2024_v56 = vor.u32 %v2232_v2, %v2021_v30 }
 0x278   : > { %1026 = vmatpush.bf16.msrb.mxu2 %v3672_v62  ;;  %v2229_v62 = vld [vmem:[%s3644_s2 + $0xd4] sm:$0xf0] }
 0x279   : > { %1271 = vmatpush.bf16.msrb.mxu0 %v1240_v25  ;;  %1067 = vmatpush.bf16.msrb.mxu3 %v3673_v41  ;;  %v1473_v19 = vpop.permute.xlu2 %1472  ;;  %v1477_v18 = vpop.permute.xlu0 %1476  ;;  %v2052_v25 = vor.u32 %v2219_v49, %v2051_v47  ;;  %v2249_v47 = vld [vmem:[%s3644_s2 + $0x174] sm:$0xf0]  ;;  %v2244_v49 = vld [vmem:[%s3644_s2 + $0x154] sm:$0xf] }
 0x27a   : > { %v1497_v13 = vsel %vm1482_vm12, %v2872_v31, %v1477_v18  ;;  %v3677_v31 = vld [vmem:[#allocation3_spill] sm:$0xff]  ;;  %v1496_v7 = vsel %vm1482_vm12, %v3058_v50, %v1473_v19  ;;  %v1469_v34 = vpop.permute.xlu1 %1468  ;;  %v2012_v50 = vor.u32 %v2227_v57, %v2011_v53  ;;  %v2061_v18 = vld [vmem:[%s3644_s2 + $0xd8] sm:$0xf0]  ;;  %v2257_v53 = vld [vmem:[%s3644_s2 + $0x1b4] sm:$0xf0] }
 0x27b   : > { %681 = vmatmul.bf16.gmra.mxu2 %v1988_v39  ;;  %v989_v29 = vsel %vm988_vm9, %v3677_v31, %v3676_v45  ;;  %v2224_v19 = vld [vmem:[%s3644_s2 + $0xb4] sm:$0xf] }
 0x27c   : > { %1027 = vmatpush.bf16.msrb.mxu2 %v990_v3  ;;  %v2064_v54 = vor.u32 %v2224_v19, %v2061_v18  ;;  %v2029_v3 = vld [vmem:[%s3644_s2 + $0x168] sm:$0xf0]  ;;  %v2083_v19 = vld [vmem:[%s3644_s2 + $0x1a0] sm:$0xf] }
 0x27d   : > { %1554 = vmatpush.bf16.msra.mxu3 %v1498_v61  ;;  %v2059_v61 = vld [vmem:[%s3644_s2 + $0xb0] sm:$0xf] }
 0x27e   : > { %720 = vmatmul.bf16.gmra.mxu3 %v1992_v40  ;;  %799 = vmatmul.bf16.gmra.mxu0 %v2004_v20  ;;  %v2027_v40 = vld [vmem:[%s3644_s2 + $0x140] sm:$0xf]  ;;  %v2247_v20 = vld [vmem:[%s3644_s2 + $0x164] sm:$0xf0] }
 0x27f   : > { %838 = vmatmul.bf16.gmra.mxu1 %v2008_v42  ;;  %1452 = vrot.lane.b32.xlu2 %v3665_v63, %s2319_s13  ;;  %v2204_v63 = vld [vmem:[%s3644_s2 + $0x14] sm:$0xf]  ;;  %v2028_v31 = vor.u32 %v2247_v20, %v2027_v40  ;;  %v2259_v40 = vld [vmem:[%s3644_s2 + $0x1c4] sm:$0xf0]  ;;  %v2254_v20 = vld [vmem:[%s3644_s2 + $0x1a4] sm:$0xf] }
 0x280   : > { %1605 = vrot.lane.b32.xlu0 %v2365_v0, %s2311_s30  ;;  %1028 = vmatpush.bf16.msrb.mxu2 %v989_v29  ;;  %v2032_v29 = vor.u32 %v2242_v51, %v2029_v3  ;;  %v2205_v51 = vld [vmem:[%s3644_s2 + $0x1c] sm:$0xf]  ;;  %v2093_v3 = vld [vmem:[%s3644_s2 + $0x40] sm:$0xf0]  ;;  %s2199_s13 = sshll.u32 %s3679_s19, 8 }
 0x281   : > { %1555 = vmatpush.bf16.msra.mxu3 %v1497_v13  ;;  %v1216_v16 = vpop.permute.xlu2 %1215  ;;  %v1220_v60 = vpop.permute.xlu0 %1219  ;;  %v2060_v13 = vor.u32 %v2229_v62, %v2059_v61  ;;  %s3566_s22 = scalar_lea.vmem %s3647_s5, %s2199_s13 }
 0x282   : > { %v1248_v15 = vsel %vm1235_vm11, %v1220_v60, %v3007_v38  ;;  %v2045_v38 = vld [vmem:[%s3644_s2 + $0x38] sm:$0xf0]  ;;  %v1212_v11 = vpop.permute.xlu1 %1211 }
 0x283   : > { %1310 = vmatpush.bf16.msrb.mxu1 %v1248_v15  ;;  %v2048_v5 = vor.u32 %v2204_v63, %v2045_v38  ;;  %v2069_v63 = vld [vmem:[%s3644_s2 + $0x128] sm:$0xf0]  ;;  %v2035_v38 = vld [vmem:[%s3644_s2 + $0x190] sm:$0xf] }
 0x284   : > { %1515 = vmatpush.bf16.msra.mxu2 %v1490_v17 }
 0x285   : > { %1556 = vmatpush.bf16.msra.mxu3 %v1496_v7 }
 0x288   : > { %1516 = vmatpush.bf16.msra.mxu2 %v1489_v21  ;;  %v2067_v21 = vld [vmem:[%s3644_s2 + $0x100] sm:$0xf] }
 0x289   : > { %v1437_v36 = vpop.permute.xlu2 %1436  ;;  %v1441_v14 = vpop.permute.xlu0 %1440  ;;  %v2068_v57 = vor.u32 %v2239_v27, %v2067_v21 }
 0x28a   : > { %v1488_v43 = vsel %vm1482_vm12, %v3079_v10, %v1441_v14  ;;  %v1487_v58 = vsel %vm1482_vm12, %v1435_v1, %v1437_v36  ;;  %v2019_v10 = vld [vmem:[%s3644_s2 + $0xf0] sm:$0xf]  ;;  %v1433_v12 = vpop.permute.xlu1 %1432 }
 0x28b   : > { %1029 = vmatmul.bf16.vlgmr.msrb.gmra.mxu2 %v2044_v22  ;;  %v2020_v59 = vor.u32 %v2237_v37, %v2019_v10  ;;  %v2072_v22 = vor.u32 %v2234_v8, %v2069_v63  ;;  %v2080_v10 = vor.u32 %v2244_v49, %v2077_v9 }
 0x28c   : > { %1517 = vmatpush.bf16.msra.mxu2 %v1488_v43  ;;  %v2036_v43 = vor.u32 %v2257_v53, %v2035_v38  ;;  %v2099_v38 = vld [vmem:[%s3644_s2 + $0x68] sm:$0xf]  ;;  %v2220_v53 = vld [vmem:[%s3644_s2 + $0x8c] sm:$0xf0] }
 0x28e   : > { %1068 = vmatmul.bf16.vlgmr.msrb.gmra.mxu3 %v2048_v5  ;;  %804 = vmatmul.bf16.gmra.mxu0 %v2012_v50  ;;  %v2040_v50 = vor.u32 %v2252_v26, %v2037_v6  ;;  %v2100_v26 = vor.u32 %v2220_v53, %v2099_v38 }
 0x28f   : > { %843 = vmatmul.bf16.gmra.mxu1 %v2016_v55 }
 0x290   : > { %1518 = vmatpush.bf16.msra.mxu2 %v1487_v58 }
 0x291   : > { %v1180_v24 = vpop.permute.xlu2 %1179  ;;  %v1184_v28 = vpop.permute.xlu0 %1183 }
 0x292   : > { %v1239_v52 = vsel %vm1235_vm11, %v1184_v28, %v3083_v48  ;;  %v1176_v41 = vpop.permute.xlu1 %1175 }
 0x293   : > { %1272 = vmatpush.bf16.msrb.mxu0 %v1239_v52  ;;  %v2075_v52 = vld [vmem:[%s3644_s2 + $0x150] sm:$0xf] }
 0x294   : > { %v2076_v4 = vor.u32 %v2249_v47, %v2075_v52  ;;  %v2139_v52 = vld [vmem:[%s3644_s2 + $0x20] sm:$0xf]  ;;  %v2211_v47 = vld [vmem:[%s3644_s2 + $0x44] sm:$0xf0] }
 0x299   : > { %v1214_v48 = vpop.permute.xlu2 %1213  ;;  %v1218_v23 = vpop.permute.xlu0 %1217 }
 0x29a   : > { %v1247_v44 = vsel %vm1235_vm11, %v1216_v16, %v1218_v23  ;;  %v1246_v46 = vsel %vm1235_vm11, %v1212_v11, %v1214_v48  ;;  %v1210_v7 = vpop.permute.xlu1 %1209 }
 0x29b   : > { %1311 = vmatpush.bf16.msrb.mxu1 %v1247_v44  ;;  %1034 = vmatmul.bf16.gmra.mxu2 %v2052_v25 }
 0x29e   : > { %1073 = vmatmul.bf16.gmra.mxu3 %v2056_v32  ;;  %809 = vmatmul.bf16.gmra.mxu0 %v2020_v59 }
 0x29f   : > { %1312 = vmatpush.bf16.msrb.mxu1 %v1246_v46  ;;  %v2091_v46 = vld [vmem:[%s3644_s2 + $0x18] sm:$0xf] }
 0x2a0   : > { %848 = vmatmul.bf16.gmra.mxu1 %v2024_v56 }
 0x2a1   : > { %v1463_v39 = vpop.permute.xlu2 %1462  ;;  %v1467_v33 = vpop.permute.xlu0 %1466 }
 0x2a2   : > { %v1495_v35 = vsel %vm1482_vm12, %v1467_v33, %v1469_v34  ;;  %v1459_v36 = vpop.permute.xlu1 %1458 }
 0x2a3   : > { %1557 = vmatpush.bf16.msra.mxu3 %v1495_v35 }
 0x2a9   : > { %v1182_v42 = vpop.permute.xlu0 %1181  ;;  %v1178_v1 = vpop.permute.xlu2 %1177 }
 0x2aa   : > { %v1238_v45 = vsel %vm1235_vm11, %v1180_v24, %v1182_v42  ;;  %v1237_v17 = vsel %vm1235_vm11, %v1176_v41, %v1178_v1  ;;  %v1174_v11 = vpop.permute.xlu1 %1173  ;;  %v2084_v1 = vor.u32 %v2259_v40, %v2083_v19 }
 0x2ab   : > { %1273 = vmatpush.bf16.msrb.mxu0 %v1238_v45  ;;  %1039 = vmatmul.bf16.gmra.mxu2 %v2060_v13  ;;  %v2085_v13 = vld [vmem:[%s3644_s2 + $0x1c8] sm:$0xf0] }
 0x2ac   : > { %v2088_v45 = vor.u32 %v2254_v20, %v2085_v13  ;;  %v2216_v13 = vld [vmem:[%s3644_s2 + $0x74] sm:$0xf] }
 0x2ae   : > { %1078 = vmatmul.bf16.gmra.mxu3 %v2064_v54  ;;  %814 = vmatmul.bf16.gmra.mxu0 %v2028_v31 }
 0x2af   : > { %1274 = vmatpush.bf16.msrb.mxu0 %v1237_v17 }
 0x2b0   : > { %853 = vmatmul.bf16.gmra.mxu1 %v2032_v29 }
 0x2b1   : > { %v1431_v16 = vpop.permute.xlu0 %1430  ;;  %v1427_v60 = vpop.permute.xlu2 %1426 }
 0x2b2   : > { %v1486_v15 = vsel %vm1482_vm12, %v1431_v16, %v1433_v12  ;;  %v1423_v30 = vpop.permute.xlu1 %1422  ;;  %v2096_v16 = vor.u32 %v2205_v51, %v2093_v3 }
 0x2b3   : > { %1519 = vmatpush.bf16.msra.mxu2 %v1486_v15 }
 0x2b9   : > { %v1465_v34 = vpop.permute.xlu0 %1464  ;;  %v1461_v14 = vpop.permute.xlu2 %1460 }
 0x2ba   : > { %v1494_v5 = vsel %vm1482_vm12, %v1463_v39, %v1465_v34  ;;  %v1493_v55 = vsel %vm1482_vm12, %v1459_v36, %v1461_v14  ;;  %v2210_v39 = vld [vmem:[%s3644_s2 + $0x3c] sm:$0xf0]  ;;  %v1457_v15 = vpop.permute.xlu1 %1456 }
 0x2bb   : > { %1558 = vmatpush.bf16.msra.mxu3 %v1494_v5  ;;  %1044 = vmatmul.bf16.gmra.mxu2 %v2068_v57  ;;  %v2092_v62 = vor.u32 %v2210_v39, %v2091_v46  ;;  %v2230_v46 = vld [vmem:[%s3644_s2 + $0xdc] sm:$0xf0] }
 0x2be   : > { %1083 = vmatmul.bf16.gmra.mxu3 %v2072_v22  ;;  %819 = vmatmul.bf16.gmra.mxu0 %v2036_v43  ;;  %v2206_v43 = vld [vmem:[%s3644_s2 + $0x24] sm:$0xf] }
 0x2bf   : > { %1559 = vmatpush.bf16.msra.mxu3 %v1493_v55 }
 0x2c0   : > { %858 = vmatmul.bf16.gmra.mxu1 %v2040_v50  ;;  %v2141_v50 = vld [vmem:[%s3644_s2 + $0x48] sm:$0xf0] }
 0x2c1   : > { %v1204_v58 = vpop.permute.xlu2 %1203  ;;  %v1208_v24 = vpop.permute.xlu0 %1207  ;;  %v2144_v49 = vor.u32 %v2206_v43, %v2141_v50 }
 0x2c2   : > { %v1245_v28 = vsel %vm1235_vm11, %v1208_v24, %v1210_v7  ;;  %v1451_v14 = vpop.permute.xlu1 %1450  ;;  %v2215_v24 = vld [vmem:[%s3644_s2 + $0x6c] sm:$0xf] }
 0x2c3   : > { %1313 = vmatpush.bf16.msrb.mxu1 %v1245_v28 }
 0x2c8   : > { %v657_v37 = vpop.f32.mrf.mxu1 }
 0x2c9   : > { %v1429_v25 = vpop.permute.xlu0 %1428  ;;  %v1425_v32 = vpop.permute.xlu2 %1424 }
 0x2ca   : > { %v1485_v48 = vsel %vm1482_vm12, %v1427_v60, %v1429_v25  ;;  %v1484_v59 = vsel %vm1482_vm12, %v1423_v30, %v1425_v32 }
 0x2cb   : > { %v696_v23 = vpop.f32.mrf.mxu0  ;;  %1520 = vmatpush.bf16.msra.mxu2 %v1485_v48 }
 0x2cc   : > { %v3268_v2 = vadd.f32 %v696_v23, %v657_v37  ;;  %1049 = vmatmul.bf16.gmra.mxu2 %v2076_v4  ;;  %v2140_v37 = vor.u32 %v2211_v47, %v2139_v52  ;;  %v2157_v52 = vld [vmem:[%s3644_s2 + $0xe8] sm:$0xf0] }
 0x2ce   : > { %1088 = vmatmul.bf16.gmra.mxu3 %v2080_v10  ;;  %v667_v44 = vpop.f32.mrf.mxu2 }
 0x2cf   : > { %v706_v12 = vpop.f32.mrf.mxu3  ;;  %1521 = vmatpush.bf16.msra.mxu2 %v1484_v59  ;;  %v1613_v59 = vpop.permute.xlu1 %1612 }
 0x2d0   : > { %v3271_v56 = vadd.f32 %v706_v12, %v667_v44  ;;  %v3279_v33 = vpop.f32.mrf.mxu1  ;;  %v2107_v12 = vld [vmem:[%s3644_s2 + $0xb8] sm:$0xf] }
 0x2d1   : > { %v1172_v35 = vpop.permute.xlu0 %1171  ;;  %v1419_v29 = vpop.permute.xlu2 %1418 }
 0x2d2   : > { %v1236_v61 = vsel %vm1235_vm11, %v1172_v35, %v1174_v11  ;;  %v2101_v11 = vld [vmem:[%s3644_s2 + $0x90] sm:$0xf0] }
 0x2d3   : > { %v3282_v41 = vpop.f32.mrf.mxu0  ;;  %1275 = vmatpush.bf16.msrb.mxu0 %v1236_v61  ;;  %v2104_v10 = vor.u32 %v2215_v24, %v2101_v11  ;;  %v1614_v61 = vrot.slane %v1613_v59, 4  ;;  %v2226_v11 = vld [vmem:[%s3644_s2 + $0xc4] sm:$0xf] }
 0x2d5   : > { %v1616_v51 = vsel %vm421_vm7, %v1613_v59, %v1614_v61 }
 0x2d6   : > { %v669_v18 = vpop.f32.mrf.mxu2  ;;  %1276 = vmatmul.bf16.vlgmr.msrb.gmra.mxu0 %v2092_v62  ;;  %v2108_v62 = vor.u32 %v2230_v46, %v2107_v12 }
 0x2d7   : > { %v708_v42 = vpop.f32.mrf.mxu3 }
 0x2d8   : > { %v3296_v54 = vadd.f32 %v708_v42, %v669_v18  ;;  %v662_v31 = vpop.f32.mrf.mxu1  ;;  %v2149_v42 = vld [vmem:[%s3644_s2 + $0x98] sm:$0xf0] }
 0x2d9   : > { %v1206_v17 = vpop.permute.xlu0 %1205  ;;  %v1453_v36 = vpop.permute.xlu2 %1452 }
 0x2da   : > { %v1244_v7 = vsel %vm1235_vm11, %v1204_v58, %v1206_v17  ;;  %v1491_v55 = vsel %vm1482_vm12, %v1451_v14, %v1453_v36  ;;  %v2221_v17 = vld [vmem:[%s3644_s2 + $0x94] sm:$0xf0]  ;;  %v2115_v36 = vld [vmem:[%s3644_s2 + $0x108] sm:$0xf]  ;;  %v2240_v14 = vld [vmem:[%s3644_s2 + $0x12c] sm:$0xf0] }
 0x2db   : > { %v701_v60 = vpop.f32.mrf.mxu0  ;;  %1314 = vmatpush.bf16.msrb.mxu1 %v1244_v7 }
 0x2dc   : > { %v3305_v21 = vadd.f32 %v701_v60, %v662_v31  ;;  %1054 = vmatmul.bf16.gmra.mxu2 %v2084_v1  ;;  %v2225_v1 = vld [vmem:[%s3644_s2 + $0xbc] sm:$0xf] }
 0x2de   : > { %1093 = vmatmul.bf16.gmra.mxu3 %v2088_v45  ;;  %v672_v27 = vpop.f32.mrf.mxu2  ;;  %1315 = vmatmul.bf16.vlgmr.msrb.gmra.mxu1 %v2096_v16  ;;  %v2152_v16 = vor.u32 %v2216_v13, %v2149_v42 }
 0x2df   : > { %v711_v8 = vpop.f32.mrf.mxu3 }
 0x2e0   : > { %v3307_v63 = vadd.f32 %v711_v8, %v672_v27  ;;  %v3315_v57 = vpop.f32.mrf.mxu1 }
 0x2e1   : > { %v1455_v34 = vpop.permute.xlu0 %1454 }
 0x2e2   : > { %v1492_v22 = vsel %vm1482_vm12, %v1455_v34, %v1457_v15 }
 0x2e3   : > { %v3318_v6 = vpop.f32.mrf.mxu0  ;;  %1560 = vmatpush.bf16.msra.mxu3 %v1492_v22 }
 0x2e4   : > { %v704_v22 = vadd.f32 %v3318_v6, %v3315_v57 }
 0x2e6   : > { %v674_v5 = vpop.f32.mrf.mxu2  ;;  %1281 = vmatmul.bf16.gmra.mxu0 %v2100_v26 }
 0x2e7   : > { %v713_v58 = vpop.f32.mrf.mxu3  ;;  %1561 = vmatpush.bf16.msra.mxu3 %v1491_v55 }
 0x2e8   : > { %v3330_v28 = vadd.f32 %v713_v58, %v674_v5  ;;  %v2116_v58 = vor.u32 %v2240_v14, %v2115_v36 }
 0x2e9   : > { %v1421_v9 = vpop.permute.xlu0 %1420 }
 0x2ea   : > { %v1483_v4 = vsel %vm1482_vm12, %v1419_v29, %v1421_v9  ;;  %v2147_v29 = vld [vmem:[%s3644_s2 + $0x70] sm:$0xf]  ;;  %v2235_v9 = vld [vmem:[%s3644_s2 + $0x10c] sm:$0xf] }
 0x2eb   : > { %v795_v25 = vpop.f32.mrf.mxu0  ;;  %v834_v48 = vpop.f32.mrf.mxu1  ;;  %1522 = vmatpush.bf16.msra.mxu2 %v1483_v4  ;;  %v2148_v15 = vor.u32 %v2221_v17, %v2147_v29  ;;  %v2163_v17 = vld [vmem:[%s3644_s2 + $0x110] sm:$0xf] }
 0x2ec   : > { %v796_v23 = vadd.f32 %v795_v25, %v3268_v2  ;;  %v2231_v25 = vld [vmem:[%s3644_s2 + $0xe4] sm:$0xf0] }
 0x2ee   : > { %1562 = vmatmul.bf16.vlgmr.msra.gmra.mxu3 %v2144_v49  ;;  %v3343_v32 = vadd.f32 %v834_v48, %v796_v23  ;;  %1320 = vmatmul.bf16.gmra.mxu1 %v2104_v10  ;;  %v677_v30 = vpop.f32.mrf.mxu2  ;;  %v2117_v10 = vld [vmem:[%s3644_s2 + $0x130] sm:$0xf0]  ;;  %v2160_v23 = vor.u32 %v2226_v11, %v2157_v52  ;;  %v2173_v11 = vld [vmem:[%s3644_s2 + $0x188] sm:$0xf0] }
 0x2ef   : > { %1523 = vmatmul.bf16.vlgmr.msra.gmra.mxu2 %v2140_v37  ;;  %v2155_v37 = vld [vmem:[%s3644_s2 + $0xc0] sm:$0xf] }
 0x2f0   : > { %v716_v44 = vpop.f32.mrf.mxu3 }
 0x2f1   : > { %v3351_v39 = vadd.f32 %v716_v44, %v677_v30  ;;  %v2120_v30 = vor.u32 %v2235_v9, %v2117_v10  ;;  %v2156_v44 = vor.u32 %v2231_v25, %v2155_v37  ;;  %v2251_v10 = vld [vmem:[%s3644_s2 + $0x184] sm:$0xf0] }
 0x2f2   : > { %v1606_v35 = vpop.permute.xlu0 %1605 }
 0x2f3   : > { %v1607_v2 = vrot.slane %v1606_v35, 4  ;;  %v3353_v19 = vpop.f32.mrf.mxu0  ;;  %v3355_v18 = vpop.f32.mrf.mxu1 }
 0x2f5   : > { %v1609_v40 = vsel %vm408_vm8, %v1606_v35, %v1607_v2 }
 0x2f6   : > { %v1611_v20 = vmax.f32 %v2365_v0, %v1609_v40  ;;  %v679_v3 = vpop.f32.mrf.mxu2  ;;  %1286 = vmatmul.bf16.gmra.mxu0 %v2108_v62  ;;  %v2109_v0 = vld [vmem:[%s3644_s2 + $0xe0] sm:$0xf0]  ;;  %v2123_v62 = vld [vmem:[%s3644_s2 + $0x158] sm:$0xf]  ;;  %v2250_v40 = vld [vmem:[%s3644_s2 + $0x17c] sm:$0xf0] }
 0x2f7   : > { %v2112_v60 = vor.u32 %v2225_v1, %v2109_v0  ;;  %v2236_v1 = vld [vmem:[%s3644_s2 + $0x114] sm:$0xf] }
 0x2f8   : > { %v1618_v45 = vmax.f32 %v1611_v20, %v1616_v51  ;;  %v718_v31 = vpop.f32.mrf.mxu3 }
 0x2f9   : > { %v3378_v7 = vadd.f32 %v718_v31, %v679_v3 }
 0x2fa   : > { %1620 = vst [vmem:[#allocation1] ss:$2 sm:$0xff] %v1618_v45  ;;  %v2165_v45 = vld [vmem:[%s3644_s2 + $0x138] sm:$0xf0] }
 0x2fb   : > { %v800_v27 = vpop.f32.mrf.mxu0 }
 0x2fc   : > { %v801_v8 = vadd.f32 %v800_v27, %v3305_v21  ;;  %v839_v38 = vpop.f32.mrf.mxu1 }
 0x2fe   : > { %1567 = vmatmul.bf16.gmra.mxu3 %v2152_v16  ;;  %v3381_v53 = vadd.f32 %v839_v38, %v801_v8  ;;  %1325 = vmatmul.bf16.gmra.mxu1 %v2112_v60  ;;  %v682_v34 = vpop.f32.mrf.mxu2  ;;  %v2241_v16 = vld [vmem:[%s3644_s2 + $0x134] sm:$0xf0] }
 0x2ff   : > { %1528 = vmatmul.bf16.gmra.mxu2 %v2148_v15  ;;  %v2168_v15 = vor.u32 %v2236_v1, %v2165_v45  ;;  %v2164_v8 = vor.u32 %v2241_v16, %v2163_v17 }
 0x301   : > { %v721_v26 = vpop.f32.mrf.mxu3  ;;  %v1622_v5 = vld.sshfl [vmem:[#allocation1 + $0x8] sm:$0xff pattern:$0x75316420]  ;;  %v1621_v43 = vld.sshfl [vmem:[#allocation1] sm:$0xff pattern:$0x75316420] }
 0x302   : > { %v3391_v21 = vadd.f32 %v721_v26, %v682_v34  ;;  %v1626_v50 = vpack.c.bf16 %v1622_v5, %v1622_v5  ;;  %v1625_v55 = vpack.c.bf16 %v1621_v43, %v1621_v43  ;;  %v2131_v5 = vld [vmem:[%s3644_s2 + $0x1a8] sm:$0xf]  ;;  %v2260_v43 = vld [vmem:[%s3644_s2 + $0x1cc] sm:$0xf0] }
 0x303   : > { %v802_v24 = vpop.f32.mrf.mxu0 }
 0x304   : > { %1641 = vrot.lane.b32.xlu0 %v1626_v50, %s2320_s26  ;;  %1639 = vrot.lane.b32.xlu2 %v1625_v55, %s2320_s26  ;;  %v803_v57 = vadd.f32 %v802_v24, %v704_v22  ;;  %v841_v6 = vpop.f32.mrf.mxu1 }
 0x306   : > { %v3399_v47 = vadd.f32 %v841_v6, %v803_v57  ;;  %v684_v49 = vpop.f32.mrf.mxu2  ;;  %1291 = vmatmul.bf16.gmra.mxu0 %v2116_v58  ;;  %v2246_v6 = vld [vmem:[%s3644_s2 + $0x164] sm:$0xf] }
 0x307   : > { %v2176_v25 = vor.u32 %v2246_v6, %v2173_v11 }
 0x309   : > { %v723_v4 = vpop.f32.mrf.mxu3 }
 0x30a   : > { %v3413_v48 = vadd.f32 %v723_v4, %v684_v49  ;;  %v2171_v4 = vld [vmem:[%s3644_s2 + $0x160] sm:$0xf] }
 0x30b   : > { %v805_v59 = vpop.f32.mrf.mxu0 }
 0x30c   : > { %v806_v12 = vadd.f32 %v805_v59, %v3271_v56  ;;  %v844_v46 = vpop.f32.mrf.mxu1  ;;  %v2124_v56 = vor.u32 %v2250_v40, %v2123_v62 }
 0x30e   : > { %1572 = vmatmul.bf16.gmra.mxu3 %v2160_v23  ;;  %v3416_v35 = vadd.f32 %v844_v46, %v806_v12  ;;  %1330 = vmatmul.bf16.gmra.mxu1 %v2120_v30  ;;  %v1030_v2 = vpop.f32.mrf.mxu2 }
 0x30f   : > { %1533 = vmatmul.bf16.gmra.mxu2 %v2156_v44  ;;  %v2172_v44 = vor.u32 %v2251_v10, %v2171_v4 }
 0x311   : > { %v1069_v61 = vpop.f32.mrf.mxu3 }
 0x312   : > { %v1070_v20 = vadd.f32 %v1069_v61, %v1030_v2 }
 0x313   : > { %v807_v42 = vpop.f32.mrf.mxu0 }
 0x314   : > { %v3425_v13 = vadd.f32 %v1070_v20, %v3343_v32  ;;  %v808_v51 = vadd.f32 %v807_v42, %v3296_v54  ;;  %v846_v3 = vpop.f32.mrf.mxu1  ;;  %v2245_v32 = vld [vmem:[%s3644_s2 + $0x15c] sm:$0xf]  ;;  %v2125_v54 = vld [vmem:[%s3644_s2 + $0x180] sm:$0xf0] }
 0x315   : > { %v2128_v27 = vor.u32 %v2245_v32, %v2125_v54 }
 0x316   : > { %v3434_v31 = vadd.f32 %v846_v3, %v808_v51  ;;  %v1032_v0 = vpop.f32.mrf.mxu2  ;;  %1296 = vmatmul.bf16.gmra.mxu0 %v2124_v56  ;;  %v2256_v51 = vld [vmem:[%s3644_s2 + $0x1b4] sm:$0xf] }
 0x319   : > { %v1071_v29 = vpop.f32.mrf.mxu3 }
 0x31a   : > { %v3448_v60 = vadd.f32 %v1071_v29, %v1032_v0 }
 0x31b   : > { %v810_v38 = vpop.f32.mrf.mxu0 }
 0x31c   : > { %v811_v34 = vadd.f32 %v810_v38, %v3307_v63  ;;  %v2132_v63 = vor.u32 %v2260_v43, %v2131_v5 }
 0x31d   : > { %v849_v22 = vpop.f32.mrf.mxu1 }
 0x31e   : > { %1577 = vmatmul.bf16.gmra.mxu3 %v2168_v15  ;;  %v850_v26 = vadd.f32 %v849_v22, %v811_v34  ;;  %1335 = vmatmul.bf16.gmra.mxu1 %v2128_v27  ;;  %v1035_v36 = vpop.f32.mrf.mxu2 }
 0x31f   : > { %1538 = vmatmul.bf16.gmra.mxu2 %v2164_v8 }
 0x321   : > { %v1074_v14 = vpop.f32.mrf.mxu3 }
 0x322   : > { %v1075_v50 = vadd.f32 %v1074_v14, %v1035_v36 }
 0x323   : > { %v812_v58 = vpop.f32.mrf.mxu0 }
 0x324   : > { %v3458_v55 = vadd.f32 %v1075_v50, %v3381_v53  ;;  %v813_v24 = vadd.f32 %v812_v58, %v3330_v28  ;;  %v2255_v53 = vld [vmem:[%s3644_s2 + $0x1ac] sm:$0xf]  ;;  %v2133_v28 = vld [vmem:[%s3644_s2 + $0x1d0] sm:$0xf0] }
 0x325   : > { %v851_v57 = vpop.f32.mrf.mxu1  ;;  %v2136_v30 = vor.u32 %v2255_v53, %v2133_v28 }
 0x326   : > { %v852_v52 = vadd.f32 %v851_v57, %v813_v24  ;;  %v1037_v49 = vpop.f32.mrf.mxu2  ;;  %1301 = vmatmul.bf16.gmra.mxu0 %v2132_v63 }
 0x329   : > { %v1076_v9 = vpop.f32.mrf.mxu3 }
 0x32a   : > { %v1077_v37 = vadd.f32 %v1076_v9, %v1037_v49 }
 0x32b   : > { %v815_v59 = vpop.f32.mrf.mxu0 }
 0x32c   : > { %v3480_v23 = vadd.f32 %v1077_v37, %v3399_v47  ;;  %v816_v12 = vadd.f32 %v815_v59, %v3351_v39  ;;  %v2181_v39 = vld [vmem:[%s3644_s2 + $0x1d8] sm:$0xf0] }
 0x32d   : > { %v854_v46 = vpop.f32.mrf.mxu1  ;;  %v2184_v32 = vor.u32 %v2256_v51, %v2181_v39 }
 0x32e   : > { %1582 = vmatmul.bf16.gmra.mxu3 %v2176_v25  ;;  %v855_v2 = vadd.f32 %v854_v46, %v816_v12  ;;  %1340 = vmatmul.bf16.gmra.mxu1 %v2136_v30  ;;  %v1040_v61 = vpop.f32.mrf.mxu2 }
 0x32f   : > { %1543 = vmatmul.bf16.gmra.mxu2 %v2172_v44 }
 0x331   : > { %v1079_v62 = vpop.f32.mrf.mxu3 }
 0x332   : > { %v1080_v40 = vadd.f32 %v1079_v62, %v1040_v61  ;;  %v699_v61 = vadd.f32 %v3282_v41, %v3279_v33 }
 0x333   : > { %v817_v56 = vpop.f32.mrf.mxu0 }
 0x334   : > { %v3484_v20 = vadd.f32 %v1080_v40, %v3416_v35  ;;  %v818_v47 = vadd.f32 %v817_v56, %v3378_v7  ;;  %v2179_v35 = vld [vmem:[%s3644_s2 + $0x1b0] sm:$0xf]  ;;  %v2261_v7 = vld [vmem:[%s3644_s2 + $0x1d4] sm:$0xf0]  ;;  %v798_v56 = vadd.f32 %v3353_v19, %v699_v61 }
 0x335   : > { %v856_v42 = vpop.f32.mrf.mxu1  ;;  %v2180_v54 = vor.u32 %v2261_v7, %v2179_v35 }
 0x336   : > { %v857_v3 = vadd.f32 %v856_v42, %v818_v47  ;;  %v1042_v1 = vpop.f32.mrf.mxu2  ;;  %v837_v33 = vadd.f32 %v3355_v18, %v798_v56 }
 0x338   : > { %v1100_v18 = vadd.f32 %v3448_v60, %v837_v33 }
 0x339   : > { %v1081_v45 = vpop.f32.mrf.mxu3 }
 0x33a   : > { %v1082_v0 = vadd.f32 %v1081_v45, %v1042_v1 }
 0x33b   : > { %v820_v17 = vpop.f32.mrf.mxu0 }
 0x33c   : > { %v3500_v29 = vadd.f32 %v1082_v0, %v3434_v31  ;;  %v821_v16 = vadd.f32 %v820_v17, %v3391_v21  ;;  %v2262_v0 = vld [vmem:[%s3645_s3] sm:$0xff] }
 0x33d   : > { %v859_v15 = vpop.f32.mrf.mxu1 }
 0x33e   : > { %1587 = vmatmul.bf16.gmra.mxu3 %v2184_v32  ;;  %v860_v27 = vadd.f32 %v859_v15, %v821_v16  ;;  %v1045_v8 = vpop.f32.mrf.mxu2  ;;  %v2263_v32 = vld [vmem:[%s3645_s3 + $0x8] sm:$0xff] }
 0x33f   : > { %1548 = vmatmul.bf16.gmra.mxu2 %v2180_v54 }
 0x341   : > { %v1084_v38 = vpop.f32.mrf.mxu3 }
 0x342   : > { %v1085_v34 = vadd.f32 %v1084_v38, %v1045_v8 }
 0x343   : > { %v822_v36 = vpop.f32.mrf.mxu0 }
 0x344   : > { %v3503_v22 = vadd.f32 %v1085_v34, %v850_v26  ;;  %v823_v14 = vadd.f32 %v822_v36, %v3413_v48 }
 0x345   : > { %v861_v5 = vpop.f32.mrf.mxu1 }
 0x346   : > { %v862_v43 = vadd.f32 %v861_v5, %v823_v14  ;;  %v1047_v31 = vpop.f32.mrf.mxu2 }
 0x349   : > { %v1086_v50 = vpop.f32.mrf.mxu3 }
 0x34a   : > { %v1087_v63 = vadd.f32 %v1086_v50, %v1047_v31 }
 0x34c   : > { %v3506_v58 = vadd.f32 %v1087_v63, %v852_v52 }
 0x34f   : > { %v1050_v21 = vpop.f32.mrf.mxu2 }
 0x351   : > { %v1089_v24 = vpop.f32.mrf.mxu3 }
 0x352   : > { %v1090_v57 = vadd.f32 %v1089_v24, %v1050_v21 }
 0x353   : > { %v1277_v11 = vpop.f32.mrf.mxu0 }
 0x354   : > { %v3508_v6 = vadd.f32 %v1090_v57, %v855_v2 }
 0x357   : > { %v1052_v49 = vpop.f32.mrf.mxu2 }
 0x359   : > { %v1091_v53 = vpop.f32.mrf.mxu3 }
 0x35a   : > { %v1092_v26 = vadd.f32 %v1091_v53, %v1052_v49 }
 0x35b   : > { %v1316_v28 = vpop.f32.mrf.mxu1  ;;  %v1279_v48 = vpop.f32.mrf.mxu0 }
 0x35c   : > { %v3510_v9 = vadd.f32 %v1092_v26, %v857_v3  ;;  %v1317_v62 = vadd.f32 %v1316_v28, %v1277_v11 }
 0x35e   : > { %v1346_v42 = vadd.f32 %v1317_v62, %v3425_v13  ;;  %v1640_v1 = vpop.permute.xlu2 %1639 }
 0x35f   : > { %v1055_v4 = vpop.f32.mrf.mxu2 }
 0x361   : > { %v1094_v10 = vpop.f32.mrf.mxu3 }
 0x362   : > { %v1095_v37 = vadd.f32 %v1094_v10, %v1055_v4 }
 0x363   : > { %v1318_v52 = vpop.f32.mrf.mxu1  ;;  %v1282_v12 = vpop.f32.mrf.mxu0 }
 0x364   : > { %v3512_v25 = vadd.f32 %v1095_v37, %v860_v27  ;;  %v1319_v35 = vadd.f32 %v1318_v52, %v1279_v48 }
 0x366   : > { %v1347_v17 = vadd.f32 %v1319_v35, %v1100_v18 }
 0x367   : > { %v1057_v30 = vpop.f32.mrf.mxu2 }
 0x369   : > { %v1096_v44 = vpop.f32.mrf.mxu3 }
 0x36a   : > { %v1097_v59 = vadd.f32 %v1096_v44, %v1057_v30 }
 0x36b   : > { %v1321_v2 = vpop.f32.mrf.mxu1  ;;  %v1284_v39 = vpop.f32.mrf.mxu0 }
 0x36c   : > { %v3514_v46 = vadd.f32 %v1097_v59, %v862_v43  ;;  %v1322_v34 = vadd.f32 %v1321_v2, %v1282_v12 }
 0x36e   : > { %v1348_v14 = vadd.f32 %v1322_v34, %v3458_v55 }
 0x371   : > { %v1563_v40 = vpop.f32.mrf.mxu3 }
 0x372   : > { %v1524_v47 = vpop.f32.mrf.mxu2 }
 0x373   : > { %v1564_v51 = vadd.f32 %v1563_v40, %v1524_v47  ;;  %v1323_v3 = vpop.f32.mrf.mxu1  ;;  %v1287_v27 = vpop.f32.mrf.mxu0 }
 0x374   : > { %v1324_v50 = vadd.f32 %v1323_v3, %v1284_v39 }
 0x375   : > { %v1593_v41 = vadd.f32 %v1564_v51, %v1346_v42 }
 0x376   : > { %v1642_v45 = vpop.permute.xlu0 %1641  ;;  %v1349_v11 = vadd.f32 %v1324_v50, %v3480_v23 }
 0x377   : > { %1673 = vst [vmem:[%s3524_s14] sm:$0xff] %v1593_v41  ;;  %v1644_v19 = vsel %vm1643_vm13, %v1640_v1, %v1642_v45  ;;  %1689 = vadd.xlane.f32.xlu1 %v1593_v41  ;;  %v1737_v8 = vmul.f32 %v1593_v41, %v1593_v41 }
 0x378   : > { %v1652_v13 = vsel %vm333_vm0, %v1644_v19, 0 }
 0x379   : > { %v1565_v7 = vpop.f32.mrf.mxu3  ;;  %1661 = vmatpush.bf16.msra.mxu0 %v1652_v13  ;;  %2280 = vmatpush.bf16.msra.mxu1 %v1652_v13 }
 0x37a   : > { %v1526_v54 = vpop.f32.mrf.mxu2 }
 0x37b   : > { %v1566_v16 = vadd.f32 %v1565_v7, %v1526_v54  ;;  %v1326_v38 = vpop.f32.mrf.mxu1  ;;  %v1289_v63 = vpop.f32.mrf.mxu0 }
 0x37c   : > { %2193 = vmatmul.msk.bf16.vlgmr.msra.gmra.mxu0 %vm326_vm1, %v2262_v0  ;;  %2194 = vmatmul.msk.bf16.vlgmr.msra.gmra.mxu1 %vm326_vm1, %v2263_v32  ;;  %v1327_v28 = vadd.f32 %v1326_v38, %v1287_v27 }
 0x37d   : > { %v1594_v15 = vadd.f32 %v1566_v16, %v1347_v17 }
 0x37e   : > { %v1350_v52 = vadd.f32 %v1327_v28, %v3484_v20 }
 0x37f   : > { %1674 = vst [vmem:[%s3524_s14 + $0x8] sm:$0xff] %v1594_v15  ;;  %1691 = vadd.xlane.f32.xlu2 %v1594_v15  ;;  %1753 = vadd.xlane.f32.xlu1 %v1737_v8  ;;  %v1738_v31 = vmul.f32 %v1594_v15, %v1594_v15 }
 0x381   : > { %v1568_v36 = vpop.f32.mrf.mxu3 }
 0x382   : > { %v1529_v60 = vpop.f32.mrf.mxu2 }
 0x383   : > { %v1569_v5 = vadd.f32 %v1568_v36, %v1529_v60  ;;  %v1328_v21 = vpop.f32.mrf.mxu1  ;;  %v1292_v4 = vpop.f32.mrf.mxu0 }
 0x384   : > { %v1329_v23 = vadd.f32 %v1328_v21, %v1289_v63 }
 0x385   : > { %v1595_v43 = vadd.f32 %v1569_v5, %v1348_v14 }
 0x386   : > { %v1351_v61 = vadd.f32 %v1329_v23, %v3500_v29 }
 0x387   : > { %1675 = vst [vmem:[%s3524_s14 + $0x10] sm:$0xff] %v1595_v43  ;;  %1755 = vadd.xlane.f32.xlu2 %v1738_v31  ;;  %1693 = vadd.xlane.f32.xlu0 %v1595_v43  ;;  %v1739_v26 = vmul.f32 %v1595_v43, %v1595_v43 }
 0x389   : > { %v1570_v24 = vpop.f32.mrf.mxu3 }
 0x38a   : > { %v1531_v57 = vpop.f32.mrf.mxu2 }
 0x38b   : > { %v1571_v49 = vadd.f32 %v1570_v24, %v1531_v57  ;;  %v1331_v10 = vpop.f32.mrf.mxu1  ;;  %v1294_v62 = vpop.f32.mrf.mxu0 }
 0x38c   : > { %v1332_v42 = vadd.f32 %v1331_v10, %v1292_v4 }
 0x38d   : > { %v1596_v53 = vadd.f32 %v1571_v49, %v1349_v11 }
 0x38e   : > { %v1352_v3 = vadd.f32 %v1332_v42, %v3503_v22 }
 0x38f   : > { %1676 = vst [vmem:[%s3524_s14 + $0x18] sm:$0xff] %v1596_v53  ;;  %v1740_v55 = vmul.f32 %v1596_v53, %v1596_v53  ;;  %1695 = vadd.xlane.f32.xlu2 %v1596_v53  ;;  %1757 = vadd.xlane.f32.xlu0 %v1739_v26 }
 0x391   : > { %v1573_v48 = vpop.f32.mrf.mxu3  ;;  %1759 = vadd.xlane.f32.xlu1 %v1740_v55 }
 0x392   : > { %v1534_v37 = vpop.f32.mrf.mxu2 }
 0x393   : > { %v1574_v30 = vadd.f32 %v1573_v48, %v1534_v37  ;;  %v1333_v56 = vpop.f32.mrf.mxu1  ;;  %v1297_v41 = vpop.f32.mrf.mxu0 }
 0x394   : > { %v1334_v29 = vadd.f32 %v1333_v56, %v1294_v62 }
 0x395   : > { %v1597_v44 = vadd.f32 %v1574_v30, %v1350_v52 }
 0x396   : > { %v1353_v7 = vadd.f32 %v1334_v29, %v3506_v58 }
 0x397   : > { %1677 = vst [vmem:[%s3524_s14 + $0x20] sm:$0xff] %v1597_v44  ;;  %v1741_v59 = vmul.f32 %v1597_v44, %v1597_v44 }
 0x399   : > { %v1575_v12 = vpop.f32.mrf.mxu3  ;;  %1697 = vadd.xlane.f32.xlu1 %v1597_v44  ;;  %1761 = vadd.xlane.f32.xlu2 %v1741_v59 }
 0x39a   : > { %v1536_v2 = vpop.f32.mrf.mxu2 }
 0x39b   : > { %v1576_v40 = vadd.f32 %v1575_v12, %v1536_v2  ;;  %v1336_v45 = vpop.f32.mrf.mxu1  ;;  %v1299_v54 = vpop.f32.mrf.mxu0 }
 0x39c   : > { %v1337_v18 = vadd.f32 %v1336_v45, %v1297_v41 }
 0x39d   : > { %v1598_v47 = vadd.f32 %v1576_v40, %v1351_v61 }
 0x39e   : > { %v1354_v15 = vadd.f32 %v1337_v18, %v3508_v6 }
 0x39f   : > { %1678 = vst [vmem:[%s3524_s14 + $0x28] sm:$0xff] %v1598_v47  ;;  %v1742_v20 = vmul.f32 %v1598_v47, %v1598_v47 }
 0x3a1   : > { %v1578_v51 = vpop.f32.mrf.mxu3  ;;  %1763 = vadd.xlane.f32.xlu0 %v1742_v20  ;;  %1699 = vadd.xlane.f32.xlu2 %v1598_v47 }
 0x3a2   : > { %v1539_v39 = vpop.f32.mrf.mxu2 }
 0x3a3   : > { %v1579_v33 = vadd.f32 %v1578_v51, %v1539_v39  ;;  %v1338_v22 = vpop.f32.mrf.mxu1  ;;  %v1302_v36 = vpop.f32.mrf.mxu0 }
 0x3a4   : > { %v1339_v38 = vadd.f32 %v1338_v22, %v1299_v54 }
 0x3a5   : > { %v1599_v1 = vadd.f32 %v1579_v33, %v1352_v3 }
 0x3a6   : > { %v1355_v14 = vadd.f32 %v1339_v38, %v3510_v9 }
 0x3a7   : > { %1679 = vst [vmem:[%s3524_s14 + $0x30] sm:$0xff] %v1599_v1  ;;  %v1743_v35 = vmul.f32 %v1599_v1, %v1599_v1 }
 0x3a9   : > { %v1580_v19 = vpop.f32.mrf.mxu3  ;;  %1765 = vadd.xlane.f32.xlu1 %v1743_v35  ;;  %1701 = vadd.xlane.f32.xlu0 %v1599_v1 }
 0x3aa   : > { %v1541_v13 = vpop.f32.mrf.mxu2 }
 0x3ab   : > { %v1581_v0 = vadd.f32 %v1580_v19, %v1541_v13  ;;  %v1341_v58 = vpop.f32.mrf.mxu1  ;;  %v1304_v24 = vpop.f32.mrf.mxu0 }
 0x3ac   : > { %v1342_v31 = vadd.f32 %v1341_v58, %v1302_v36 }
 0x3ad   : > { %v1600_v32 = vadd.f32 %v1581_v0, %v1353_v7 }
 0x3ae   : > { %v1356_v63 = vadd.f32 %v1342_v31, %v3512_v25 }
 0x3af   : > { %1680 = vst [vmem:[%s3524_s14 + $0x38] sm:$0xff] %v1600_v32  ;;  %v1744_v44 = vmul.f32 %v1600_v32, %v1600_v32 }
 0x3b1   : > { %v1583_v17 = vpop.f32.mrf.mxu3  ;;  %1703 = vadd.xlane.f32.xlu1 %v1600_v32 }
 0x3b2   : > { %v1544_v16 = vpop.f32.mrf.mxu2 }
 0x3b3   : > { %v1584_v27 = vadd.f32 %v1583_v17, %v1544_v16  ;;  %v1343_v57 = vpop.f32.mrf.mxu1 }
 0x3b4   : > { %v1344_v49 = vadd.f32 %v1343_v57, %v1304_v24 }
 0x3b5   : > { %v1601_v8 = vadd.f32 %v1584_v27, %v1354_v15 }
 0x3b6   : > { %v1357_v26 = vadd.f32 %v1344_v49, %v3514_v46 }
 0x3b7   : > { %1681 = vst [vmem:[%s3524_s14 + $0x40] sm:$0xff] %v1601_v8  ;;  %v1745_v62 = vmul.f32 %v1601_v8, %v1601_v8 }
 0x3b9   : > { %v1585_v34 = vpop.f32.mrf.mxu3 }
 0x3ba   : > { %v1546_v60 = vpop.f32.mrf.mxu2 }
 0x3bb   : > { %v1586_v5 = vadd.f32 %v1585_v34, %v1546_v60 }
 0x3bd   : > { %v3554_v43 = vadd.f32 %v1586_v5, %v1355_v14 }
 0x3bf   : > { %1682 = vst [vmem:[%s3524_s14 + $0x48] sm:$0xff] %v3554_v43  ;;  %v1746_v40 = vmul.f32 %v3554_v43, %v3554_v43 }
 0x3c1   : > { %v1588_v6 = vpop.f32.mrf.mxu3 }
 0x3c2   : > { %v1549_v50 = vpop.f32.mrf.mxu2 }
 0x3c3   : > { %v1589_v21 = vadd.f32 %v1588_v6, %v1549_v50 }
 0x3c5   : > { %v1603_v11 = vadd.f32 %v1589_v21, %v1356_v63 }
 0x3c7   : > { %1683 = vst [vmem:[%s3524_s14 + $0x50] sm:$0xff] %v1603_v11  ;;  %v1747_v42 = vmul.f32 %v1603_v11, %v1603_v11 }
 0x3c9   : > { %v1590_v53 = vpop.f32.mrf.mxu3 }
 0x3ca   : > { %v1551_v9 = vpop.f32.mrf.mxu2 }
 0x3cb   : > { %v1591_v28 = vadd.f32 %v1590_v53, %v1551_v9 }
 0x3cd   : > { %v1604_v55 = vadd.f32 %v1591_v28, %v1357_v26 }
 0x3cf   : > { %1684 = vst [vmem:[%s3524_s14 + $0x58] sm:$0xff] %v1604_v55  ;;  %v1748_v39 = vmul.f32 %v1604_v55, %v1604_v55 }
 0x3ea   : > { %v1690_v25 = vpop.xlane.xlu1 %1689 }
 0x3eb   : > { %1802 = vst.msk [vmem:[%s3566_s22] sm:$0xff] %vm1801_vm14, %v1690_v25 }
 0x3f2   : > { %v1692_v46 = vpop.xlane.xlu2 %1691  ;;  %v1754_v48 = vpop.xlane.xlu1 %1753 }
 0x3f3   : > { %1803 = vst.msk [vmem:[%s3566_s22 + $0x8] sm:$0xff] %vm1801_vm14, %v1692_v46 }
 0x3f4   : > { %1818 = vst.msk [vmem:[%s3566_s22 + $0x80] sm:$0xff] %vm1801_vm14, %v1754_v48 }
 0x3f9   : > { %v1663_v4 = vpop.f32.mrf.mxu0  ;;  %v1668_v10 = vpop.f32.mrf.mxu1 }
 0x3fa   : > { %1685 = vst [vmem:[%s3524_s14 + $0x60] sm:$0xff] %v1663_v4  ;;  %v1749_v37 = vmul.f32 %v1663_v4, %v1663_v4  ;;  %1717 = vadd.xlane.f32.xlu2 %v1668_v10  ;;  %1713 = vadd.xlane.f32.xlu0 %v1663_v4  ;;  %v1756_v52 = vpop.xlane.xlu2 %1755  ;;  %v1694_v30 = vpop.xlane.xlu0 %1693  ;;  %v1751_v1 = vmul.f32 %v1668_v10, %v1668_v10 }
 0x3fb   : > { %1687 = vst [vmem:[%s3524_s14 + $0x70] sm:$0xff] %v1668_v10 }
 0x3fc   : > { %1819 = vst.msk [vmem:[%s3566_s22 + $0x88] sm:$0xff] %vm1801_vm14, %v1756_v52  ;;  %1777 = vadd.xlane.f32.xlu1 %v1749_v37 }
 0x3fd   : > { %1804 = vst.msk [vmem:[%s3566_s22 + $0x10] sm:$0xff] %vm1801_vm14, %v1694_v30 }
 0x401   : > { %v1670_v23 = vpop.f32.mrf.mxu1  ;;  %v1665_v59 = vpop.f32.mrf.mxu0 }
 0x402   : > { %1688 = vst [vmem:[%s3524_s14 + $0x78] sm:$0xff] %v1670_v23  ;;  %1767 = vadd.xlane.f32.xlu2 %v1744_v44  ;;  %1719 = vadd.xlane.f32.xlu0 %v1670_v23  ;;  %v1696_v12 = vpop.xlane.xlu2 %1695  ;;  %v1758_v2 = vpop.xlane.xlu0 %1757  ;;  %v1752_v3 = vmul.f32 %v1670_v23, %v1670_v23  ;;  %v1750_v45 = vmul.f32 %v1665_v59, %v1665_v59 }
 0x403   : > { %1686 = vst [vmem:[%s3524_s14 + $0x68] sm:$0xff] %v1665_v59 }
 0x404   : > { %1715 = vadd.xlane.f32.xlu1 %v1665_v59  ;;  %1805 = vst.msk [vmem:[%s3566_s22 + $0x18] sm:$0xff] %vm1801_vm14, %v1696_v12  ;;  %v1760_v61 = vpop.xlane.xlu1 %1759 }
 0x405   : > { %1821 = vst.msk [vmem:[%s3566_s22 + $0x98] sm:$0xff] %vm1801_vm14, %v1760_v61 }
 0x406   : > { %1820 = vst.msk [vmem:[%s3566_s22 + $0x90] sm:$0xff] %vm1801_vm14, %v1758_v2 }
 0x40a   : > { %1705 = vadd.xlane.f32.xlu2 %v1601_v8  ;;  %1769 = vadd.xlane.f32.xlu0 %v1745_v62 }
 0x40c   : > { %1771 = vadd.xlane.f32.xlu1 %v1746_v40  ;;  %v1762_v56 = vpop.xlane.xlu2 %1761  ;;  %v1698_v47 = vpop.xlane.xlu1 %1697 }
 0x40d   : > { %1822 = vst.msk [vmem:[%s3566_s22 + $0xa0] sm:$0xff] %vm1801_vm14, %v1762_v56 }
 0x40e   : > { %1806 = vst.msk [vmem:[%s3566_s22 + $0x20] sm:$0xff] %vm1801_vm14, %v1698_v47 }
 0x412   : > { %1773 = vadd.xlane.f32.xlu2 %v1747_v42  ;;  %1707 = vadd.xlane.f32.xlu0 %v3554_v43 }
 0x414   : > { %v1764_v20 = vpop.xlane.xlu0 %1763  ;;  %1709 = vadd.xlane.f32.xlu1 %v1603_v11  ;;  %v1700_v51 = vpop.xlane.xlu2 %1699 }
 0x415   : > { %1823 = vst.msk [vmem:[%s3566_s22 + $0xa8] sm:$0xff] %vm1801_vm14, %v1764_v20 }
 0x416   : > { %1807 = vst.msk [vmem:[%s3566_s22 + $0x28] sm:$0xff] %vm1801_vm14, %v1700_v51 }
 0x41a   : > { %1711 = vadd.xlane.f32.xlu2 %v1604_v55  ;;  %1775 = vadd.xlane.f32.xlu0 %v1748_v39 }
 0x41c   : > { %v1702_v33 = vpop.xlane.xlu0 %1701  ;;  %v1766_v41 = vpop.xlane.xlu1 %1765  ;;  %1783 = vadd.xlane.f32.xlu1 %v1752_v3 }
 0x41d   : > { %1808 = vst.msk [vmem:[%s3566_s22 + $0x30] sm:$0xff] %vm1801_vm14, %v1702_v33 }
 0x41e   : > { %1824 = vst.msk [vmem:[%s3566_s22 + $0xb0] sm:$0xff] %vm1801_vm14, %v1766_v41 }
 0x422   : > { %1781 = vadd.xlane.f32.xlu0 %v1751_v1  ;;  %1779 = vadd.xlane.f32.xlu2 %v1750_v45 }
 0x424   : > { %v1704_v29 = vpop.xlane.xlu1 %1703 }
 0x425   : > { %1809 = vst.msk [vmem:[%s3566_s22 + $0x38] sm:$0xff] %vm1801_vm14, %v1704_v29 }
 0x46d   : > { %v1714_v35 = vpop.xlane.xlu0 %1713  ;;  %v1718_v19 = vpop.xlane.xlu2 %1717 }
 0x46e   : > { %1814 = vst.msk [vmem:[%s3566_s22 + $0x60] sm:$0xff] %vm1801_vm14, %v1714_v35 }
 0x46f   : > { %1816 = vst.msk [vmem:[%s3566_s22 + $0x70] sm:$0xff] %vm1801_vm14, %v1718_v19  ;;  %v1778_v13 = vpop.xlane.xlu1 %1777 }
 0x470   : > { %1830 = vst.msk [vmem:[%s3566_s22 + $0xe0] sm:$0xff] %vm1801_vm14, %v1778_v13 }
 0x475   : > { %v1720_v7 = vpop.xlane.xlu0 %1719  ;;  %v1768_v0 = vpop.xlane.xlu2 %1767 }
 0x476   : > { %1817 = vst.msk [vmem:[%s3566_s22 + $0x78] sm:$0xff] %vm1801_vm14, %v1720_v7 }
 0x477   : > { %1825 = vst.msk [vmem:[%s3566_s22 + $0xb8] sm:$0xff] %vm1801_vm14, %v1768_v0  ;;  %v1716_v32 = vpop.xlane.xlu1 %1715 }
 0x478   : > { %1815 = vst.msk [vmem:[%s3566_s22 + $0x68] sm:$0xff] %vm1801_vm14, %v1716_v32 }
 0x47d   : > { %v1770_v18 = vpop.xlane.xlu0 %1769  ;;  %v1706_v54 = vpop.xlane.xlu2 %1705 }
 0x47e   : > { %1826 = vst.msk [vmem:[%s3566_s22 + $0xc0] sm:$0xff] %vm1801_vm14, %v1770_v18 }
 0x47f   : > { %1810 = vst.msk [vmem:[%s3566_s22 + $0x40] sm:$0xff] %vm1801_vm14, %v1706_v54  ;;  %v1772_v22 = vpop.xlane.xlu1 %1771 }
 0x480   : > { %1827 = vst.msk [vmem:[%s3566_s22 + $0xc8] sm:$0xff] %vm1801_vm14, %v1772_v22 }
 0x485   : > { %v1708_v17 = vpop.xlane.xlu0 %1707  ;;  %v1774_v16 = vpop.xlane.xlu2 %1773 }
 0x486   : > { %1811 = vst.msk [vmem:[%s3566_s22 + $0x48] sm:$0xff] %vm1801_vm14, %v1708_v17 }
 0x487   : > { %1828 = vst.msk [vmem:[%s3566_s22 + $0xd0] sm:$0xff] %vm1801_vm14, %v1774_v16  ;;  %v1710_v15 = vpop.xlane.xlu1 %1709 }
 0x488   : > { %1812 = vst.msk [vmem:[%s3566_s22 + $0x50] sm:$0xff] %vm1801_vm14, %v1710_v15 }
 0x48d   : > { %v1776_v27 = vpop.xlane.xlu0 %1775  ;;  %v1712_v8 = vpop.xlane.xlu2 %1711 }
 0x48e   : > { %1829 = vst.msk [vmem:[%s3566_s22 + $0xd8] sm:$0xff] %vm1801_vm14, %v1776_v27 }
 0x48f   : > { %1813 = vst.msk [vmem:[%s3566_s22 + $0x58] sm:$0xff] %vm1801_vm14, %v1712_v8  ;;  %v1784_v38 = vpop.xlane.xlu1 %1783 }
 0x490   : > { %1833 = vst.msk [vmem:[%s3566_s22 + $0xf8] sm:$0xff] %vm1801_vm14, %v1784_v38 }
 0x495   : > { %v1782_v34 = vpop.xlane.xlu0 %1781  ;;  %v1780_v36 = vpop.xlane.xlu2 %1779 }
 0x496   : > { %1832 = vst.msk [vmem:[%s3566_s22 + $0xf0] sm:$0xff] %vm1801_vm14, %v1782_v34 }
 0x497   : > { %1831 = vst.msk [vmem:[%s3566_s22 + $0xe8] sm:$0xff] %vm1801_vm14, %v1780_v36 }
 0x498 PF: > { %s16_s18 = sadd.s32 1, %s2307_s18  }
 0x499   : > { %p13_p4 = scmp.ge.s32.totalorder %s16_s18, 4  }
 0x49b   :  { %15 = sbr.rel (!%p13_p4) target bundleno = 1 (0x1), region = 78 }

</bundles_post_ra>
